<compile_context>
chip_gen: v5e
topology: v5e:2x2
jax: 0.10.0
libtpu: 0.0.40
codegen_flags: <defaults>
</compile_context>

<pallas_src>
import functools

import numpy as np
import jax
import jax.numpy as jnp
from jax import lax
from jax.experimental import pallas as pl
from jax.experimental.pallas import tpu as pltpu


_MXU_DTYPE = jnp.bfloat16   # matmul operand dtype; accumulation stays f32


# ----------------------------- shared index math ----------------------------

def _row_col_f32(lane_f, W):
    """Exact integer (row, col) of flattened pixel indices, in f32 arithmetic.

    Avoids vector integer div/mod on the VPU; exact because lane < 2^23 and the
    +0.5 cushion absorbs the reciprocal rounding.
    """
    row = jnp.floor((lane_f + 0.5) * (1.0 / W))
    col = lane_f - row * W
    return row, col


def _base_grid_f32(lane_f, H, W):
    """torch meshgrid(linspace(-1,1,W), linspace(-1,1,H)) evaluated at flat pixels."""
    row, col = _row_col_f32(lane_f, W)
    grid_h = row * (2.0 / (H - 1)) - 1.0      # varies along height
    grid_w = col * (2.0 / (W - 1)) - 1.0      # varies along width
    return grid_h, grid_w


# ----------------------------- Pallas kernels ------------------------------

def _conv3x3_kernel(x_ref, w_ref, b_ref, o_ref, *, H, W):
    """3x3 stride-1 pad-1 conv (PyTorch cross-correlation) for one batch element.

    Layout: NCHW with spatial flattened, M = H*W on the lane axis (lane-dense).
      x_ref: (1, Cin, M) f32     w_ref: (9, Cout, Cin) bf16 (tap-major, t = kh*3+kw)
      b_ref: (Cout, 1) f32       o_ref: (1, Cout, M) f32

    im2col is fused: each tap is a lane roll of the flattened plane plus a
    row/col boundary mask (equivalent to zero padding), accumulated as 9 small
    bf16 MXU matmuls into an f32 tile -- no 9x cols buffer ever touches HBM.
    """
    M = H * W
    Cout = o_ref.shape[1]
    x = x_ref[0]                                                   # (Cin, M) f32
    lane_f = lax.broadcasted_iota(jnp.int32, (1, M), 1).astype(jnp.float32)
    row, col = _row_col_f32(lane_f, W)                             # (1, M) each

    acc = jnp.zeros((Cout, M), jnp.float32)
    for kh in range(3):
        for kw in range(3):
            dh, dw = kh - 1, kw - 1
            d = dh * W + dw                                        # flat-index shift
            shifted = x if d == 0 else pltpu.roll(x, shift=(-d) % M, axis=1)
            # Boundary mask == zero padding (also kills the roll wrap-around
            # and the row-crossing aliasing of the +-1 column shifts).
            cond = None
            if dh == -1:
                cond = row >= 1.0
            elif dh == 1:
                cond = row <= float(H - 2)
            if dw == -1:
                c2 = col >= 1.0
                cond = c2 if cond is None else cond & c2
            elif dw == 1:
                c2 = col <= float(W - 2)
                cond = c2 if cond is None else cond & c2
            if cond is not None:
                shifted = jnp.where(cond, shifted, jnp.zeros_like(shifted))
            acc = acc + jnp.dot(w_ref[kh * 3 + kw],                # (Cout, Cin) bf16
                                shifted.astype(_MXU_DTYPE),        # (Cin, M) bf16
                                preferred_element_type=jnp.float32)
    o_ref[0] = acc + b_ref[...]                                    # f32 bias broadcast


def _grid_sample_kernel(x_ref, off_ref, o_ref, *, C, H, W):
    """Bilinear grid_sample (zeros padding, align_corners=False) for one batch
    element, all C planes per grid step, sampling coordinates built in-kernel.

      x_ref:   (1, C, H, W) f32  source planes
      off_ref: (1, 2C, M)   f32  offset-conv output ([0:C]=offset_w, [C:2C]=offset_h)
      o_ref:   (1, C, M)    f32  sampled planes (lane-dense, M = H*W)

    out[c, m] = sum_{i,j} hat(ys[c,m]-i) * hat(xs[c,m]-j) * X[c,i,j],
    hat(d) = max(0, 1-|d|)  ==  F.grid_sample(bilinear, zeros, align_corners=False).
    The X @ hat_x contraction runs on the MXU in bf16 (f32 accumulation); the
    coordinate and hat-weight construction stays in f32.
    """
    M = H * W
    lane_f = lax.broadcasted_iota(jnp.int32, (1, M), 1).astype(jnp.float32)
    grid_h, grid_w = _base_grid_f32(lane_f, H, W)                  # (1, M) each
    jj = lax.broadcasted_iota(jnp.int32, (W, M), 0).astype(jnp.float32)
    ii = lax.broadcasted_iota(jnp.int32, (H, M), 0).astype(jnp.float32)
    off = off_ref[0]                                               # (2C, M) f32
    for c in range(C):
        off_w = off[c:c + 1, :]                                    # (1, M)
        off_h = off[C + c:C + c + 1, :]                            # (1, M)
        # torch.stack((offset_h, offset_w), 3): grid[...,0]=x coord, grid[...,1]=y coord
        cx = off_h + grid_h
        cy = off_w + grid_w
        xs = ((cx + 1.0) * W - 1.0) * 0.5                          # align_corners=False
        ys = ((cy + 1.0) * H - 1.0) * 0.5
        wx = jnp.maximum(0.0, 1.0 - jnp.abs(xs - jj))              # (W, M) f32
        wy = jnp.maximum(0.0, 1.0 - jnp.abs(ys - ii))              # (H, M) f32
        t = jnp.dot(x_ref[0, c].astype(_MXU_DTYPE),                # (H, W) bf16
                    wx.astype(_MXU_DTYPE),                         # (W, M) bf16
                    preferred_element_type=jnp.float32)            # (H, M) f32
        o_ref[0, pl.ds(c, 1), :] = jnp.sum(wy * t, axis=0, keepdims=True)


# ------------------------------ wrappers ------------------------------------

def conv3x3_same(x_flat, w_oihw, bias, H, W):
    """3x3 'same' conv. x_flat: (N, Cin, H*W) f32 NCHW-flat -> (N, Cout, H*W) f32."""
    N, Cin, M = x_flat.shape
    Cout = w_oihw.shape[0]
    # (Cout, Cin, kh, kw) -> (9, Cout, Cin), tap-major (t = kh*3 + kw)
    w_taps = jnp.transpose(w_oihw, (2, 3, 0, 1)).reshape(9, Cout, Cin).astype(_MXU_DTYPE)
    b = (jnp.zeros((Cout, 1), jnp.float32) if bias is None
         else bias.reshape(Cout, 1).astype(jnp.float32))
    kernel = functools.partial(_conv3x3_kernel, H=H, W=W)
    return pl.pallas_call(
        kernel,
        out_shape=jax.ShapeDtypeStruct((N, Cout, M), jnp.float32),
        grid=(N,),
        in_specs=[
            pl.BlockSpec((1, Cin, M), lambda n: (n, 0, 0)),
            pl.BlockSpec((9, Cout, Cin), lambda n: (0, 0, 0)),
            pl.BlockSpec((Cout, 1), lambda n: (0, 0)),
        ],
        out_specs=pl.BlockSpec((1, Cout, M), lambda n: (n, 0, 0)),
        compiler_params=pltpu.CompilerParams(dimension_semantics=("parallel",)),
    )(x_flat, w_taps, b)


def grid_sample_planes(x_nchw, offset_flat):
    """x_nchw: (N, C, H, W); offset_flat: (N, 2C, H*W). Returns (N, C, H*W)."""
    N, C, H, W = x_nchw.shape
    M = H * W
    kernel = functools.partial(_grid_sample_kernel, C=C, H=H, W=W)
    return pl.pallas_call(
        kernel,
        out_shape=jax.ShapeDtypeStruct((N, C, M), jnp.float32),
        grid=(N,),
        in_specs=[
            pl.BlockSpec((1, C, H, W), lambda n: (n, 0, 0, 0)),
            pl.BlockSpec((1, 2 * C, M), lambda n: (n, 0, 0)),
        ],
        out_specs=pl.BlockSpec((1, C, M), lambda n: (n, 0, 0)),
        compiler_params=pltpu.CompilerParams(dimension_semantics=("parallel",)),
    )(x_nchw, offset_flat)


def conv2d_deformable_forward(x, w_offset, w_regular, b_regular):
    """Pallas port of Conv2dDeformable.forward. x: (N, C, H, W) f32 NCHW."""
    N, C, H, W = x.shape
    x_flat = x.reshape(N, C, H * W)                         # free minor-dim merge
    offset = conv3x3_same(x_flat, w_offset, None, H, W)     # (N, 2C, M) offset field
    sampled = grid_sample_planes(x, offset)                 # (N, C, M)  deformed input
    out = conv3x3_same(sampled, w_regular, b_regular, H, W) # (N, Cout, M)
    return out.reshape(N, -1, H, W)                         # already NCHW


# --------------- dtype-matched reference (tight structural check) -----------

def _matched_conv3x3(x_nchw, w_oihw, bias):
    """Same math as the Pallas conv: per-tap bf16 operands, f32 accumulation."""
    N, Cin, H, W = x_nchw.shape
    Cout = w_oihw.shape[0]
    xp = jnp.pad(x_nchw, ((0, 0), (0, 0), (1, 1), (1, 1)))
    acc = jnp.zeros((N, Cout, H, W), jnp.float32)
    for kh in range(3):
        for kw in range(3):
            tap = xp[:, :, kh:kh + H, kw:kw + W].astype(_MXU_DTYPE)
            wt = w_oihw[:, :, kh, kw].astype(_MXU_DTYPE)
            acc = acc + jnp.einsum('oc,nchw->nohw', wt, tap,
                                   preferred_element_type=jnp.float32)
    if bias is not None:
        acc = acc + bias.astype(jnp.float32)[None, :, None, None]
    return acc


def _matched_grid_sample(x_nchw, offset_flat):
    N, C, H, W = x_nchw.shape
    M = H * W
    lane_f = jnp.arange(M, dtype=jnp.int32).astype(jnp.float32)
    grid_h, grid_w = _base_grid_f32(lane_f, H, W)                  # (M,) each
    off_w = offset_flat[:, :C, :]                                  # (N, C, M)
    off_h = offset_flat[:, C:, :]
    cx = off_h + grid_h[None, None, :]
    cy = off_w + grid_w[None, None, :]
    xs = ((cx + 1.0) * W - 1.0) * 0.5
    ys = ((cy + 1.0) * H - 1.0) * 0.5
    jj = jnp.arange(W, dtype=jnp.float32)
    ii = jnp.arange(H, dtype=jnp.float32)
    wx = jnp.maximum(0.0, 1.0 - jnp.abs(xs[:, :, None, :] - jj[None, None, :, None]))
    wy = jnp.maximum(0.0, 1.0 - jnp.abs(ys[:, :, None, :] - ii[None, None, :, None]))
    t = jnp.einsum('nchw,ncwm->nchm',
                   x_nchw.astype(_MXU_DTYPE), wx.astype(_MXU_DTYPE),
                   preferred_element_type=jnp.float32)
    return jnp.sum(wy * t, axis=2)                                 # (N, C, M)


def _matched_forward(x, w_offset, w_regular, b_regular):
    N, C, H, W = x.shape
    offset = _matched_conv3x3(x, w_offset, None).reshape(N, 2 * C, H * W)
    sampled = _matched_grid_sample(x, offset).reshape(N, C, H, W)
    return _matched_conv3x3(sampled, w_regular, b_regular)


# ------------------ full-f32 semantic reference (HIGHEST) -------------------

def _ref_conv3x3(x, w, b=None):
    out = lax.conv_general_dilated(x, w, (1, 1), 'SAME',
                                   dimension_numbers=('NCHW', 'OIHW', 'NCHW'),
                                   precision=lax.Precision.HIGHEST)
    if b is not None:
        out = out + b[None, :, None, None]
    return out


def _ref_grid_sample(planes, cx, cy):
    P, H, W = planes.shape
    xs = ((cx + 1.0) * W - 1.0) * 0.5
    ys = ((cy + 1.0) * H - 1.0) * 0.5
    x0 = jnp.floor(xs); x1 = x0 + 1.0
    y0 = jnp.floor(ys); y1 = y0 + 1.0
    flat = planes.reshape(P, H * W)

    def gather(ix, iy):
        valid = (ix >= 0) & (ix <= W - 1) & (iy >= 0) & (iy <= H - 1)
        ixc = jnp.clip(ix, 0, W - 1).astype(jnp.int32)
        iyc = jnp.clip(iy, 0, H - 1).astype(jnp.int32)
        idx = (iyc * W + ixc).reshape(P, H * W)
        vals = jnp.take_along_axis(flat, idx, axis=1).reshape(P, H, W)
        return jnp.where(valid, vals, 0.0)

    wx1 = xs - x0; wx0 = 1.0 - wx1
    wy1 = ys - y0; wy0 = 1.0 - wy1
    return (gather(x0, y0) * wx0 * wy0 + gather(x1, y0) * wx1 * wy0 +
            gather(x0, y1) * wx0 * wy1 + gather(x1, y1) * wx1 * wy1)


def _ref_forward(x, w_offset, w_regular, b_regular):
    N, C, H, W = x.shape
    offset = _ref_conv3x3(x, w_offset)
    offset_w = offset[:, :C]; offset_h = offset[:, C:]
    lin_w = jnp.linspace(-1.0, 1.0, W, dtype=jnp.float32)
    lin_h = jnp.linspace(-1.0, 1.0, H, dtype=jnp.float32)
    grid_w = jnp.broadcast_to(lin_w[None, :], (H, W))
    grid_h = jnp.broadcast_to(lin_h[:, None], (H, W))
    cx = (offset_h + grid_h).reshape(N * C, H, W)
    cy = (offset_w + grid_w).reshape(N * C, H, W)
    sampled = _ref_grid_sample(x.reshape(N * C, H, W), cx, cy).reshape(N, C, H, W)
    return _ref_conv3x3(sampled, w_regular, b_regular)


# --------------------------------- main --------------------------------------

if __name__ == "__main__":
    N, C, H, W = 2, 4, 16, 16
    COUT = 8
    key = jax.random.PRNGKey(0)
    kx, ko, kw, kb = jax.random.split(key, 4)

    x = jax.random.normal(kx, (N, C, H, W), dtype=jnp.float32)
    # offset_filter: Conv2d(C, 2C, 3, padding=1, bias=False), weight ~ N(0, 0.0005)
    w_offset = jax.random.normal(ko, (2 * C, C, 3, 3), dtype=jnp.float32) * 5e-4
    # regular_filter: Conv2d(C, COUT, 3, padding=1, bias=True)
    w_regular = jax.random.normal(kw, (COUT, C, 3, 3), dtype=jnp.float32) * 0.1
    b_regular = jax.random.normal(kb, (COUT,), dtype=jnp.float32) * 0.1

    fwd = jax.jit(conv2d_deformable_forward)
    out = jax.block_until_ready(fwd(x, w_offset, w_regular, b_regular))
    assert out.shape == (N, COUT, H, W), out.shape

    # (1) Tight structural check vs. a dtype-matched pure-JAX reference (same
    #     bf16 matmul operands, f32 accumulation, same coord formulas): catches
    #     any layout / roll / mask / indexing regression at ~f32 noise level.
    ref_matched = jax.block_until_ready(
        jax.jit(_matched_forward)(x, w_offset, w_regular, b_regular))
    np.testing.assert_allclose(np.asarray(out), np.asarray(ref_matched),
                               rtol=5e-4, atol=5e-4)

    # (2) Semantic check vs. the full-f32 (precision=HIGHEST) reference: bounds
    #     the deliberate bf16-operand precision cost (typical |err| ~1e-2 through
    #     two convs + bilinear sampling at these data magnitudes).
    ref_f32 = jax.block_until_ready(
        jax.jit(_ref_forward)(x, w_offset, w_regular, b_regular))
    np.testing.assert_allclose(np.asarray(out), np.asarray(ref_f32),
                               rtol=5e-2, atol=5e-2)

    print("KERNEL_OK")
</pallas_src>

<mosaic_0001>
module attributes {stable_mosaic.version = 11 : i64} {
  func.func @_grid_sample_kernel(%arg0: i32, %arg1: memref<1x4x16x16xf32, #tpu.memory_space<vmem>>, %arg2: memref<1x8x256xf32, #tpu.memory_space<vmem>>, %arg3: memref<1x4x256xf32, #tpu.memory_space<vmem>>) attributes {dimension_semantics = [#tpu.dimension_semantics<parallel>], iteration_bounds = array<i64: 2>, scalar_prefetch = 0 : i64, scratch_operands = 0 : i64, tpu.core_type = #tpu.core_type<tc>, window_params = [{transform_indices = @transform_0, window_bounds = array<i64: 1, 4, 16, 16>}, {transform_indices = @transform_1, window_bounds = array<i64: 1, 8, 256>}, {transform_indices = @transform_2, window_bounds = array<i64: 1, 4, 256>}]} {
    %0 = tpu.iota {dimensions = array<i32: 1>} : vector<1x256xi32>
    %1 = arith.sitofp %0 : vector<1x256xi32> to vector<1x256xf32>
    %cst = arith.constant 5.000000e-01 : f32
    %2 = vector.broadcast %cst : f32 to vector<1x256xf32>
    %3 = arith.addf %1, %2 : vector<1x256xf32>
    %cst_0 = arith.constant 6.250000e-02 : f32
    %4 = vector.broadcast %cst_0 : f32 to vector<1x256xf32>
    %5 = arith.mulf %3, %4 : vector<1x256xf32>
    %6 = math.floor %5 : vector<1x256xf32>
    %cst_1 = arith.constant 1.600000e+01 : f32
    %7 = vector.broadcast %cst_1 : f32 to vector<1x256xf32>
    %8 = arith.mulf %6, %7 : vector<1x256xf32>
    %9 = arith.subf %1, %8 : vector<1x256xf32>
    %cst_2 = arith.constant 0.13333334 : f32
    %10 = vector.broadcast %cst_2 : f32 to vector<1x256xf32>
    %11 = arith.mulf %6, %10 : vector<1x256xf32>
    %cst_3 = arith.constant 1.000000e+00 : f32
    %12 = vector.broadcast %cst_3 : f32 to vector<1x256xf32>
    %13 = arith.subf %11, %12 : vector<1x256xf32>
    %cst_4 = arith.constant 0.13333334 : f32
    %14 = vector.broadcast %cst_4 : f32 to vector<1x256xf32>
    %15 = arith.mulf %9, %14 : vector<1x256xf32>
    %cst_5 = arith.constant 1.000000e+00 : f32
    %16 = vector.broadcast %cst_5 : f32 to vector<1x256xf32>
    %17 = arith.subf %15, %16 : vector<1x256xf32>
    %18 = tpu.iota {dimensions = array<i32: 0>} : vector<16x256xi32>
    %19 = arith.sitofp %18 : vector<16x256xi32> to vector<16x256xf32>
    %20 = tpu.iota {dimensions = array<i32: 0>} : vector<16x256xi32>
    %21 = arith.sitofp %20 : vector<16x256xi32> to vector<16x256xf32>
    %c0 = arith.constant 0 : index
    %c0_6 = arith.constant 0 : index
    %c0_7 = arith.constant 0 : index
    %22 = vector.load %arg2[%c0, %c0_6, %c0_7] : memref<1x8x256xf32, #tpu.memory_space<vmem>>, vector<1x8x256xf32>
    %23 = vector.shape_cast %22 : vector<1x8x256xf32> to vector<8x256xf32>
    %24 = vector.extract_strided_slice %23 {offsets = [0, 0], sizes = [1, 256], strides = [1, 1]} : vector<8x256xf32> to vector<1x256xf32>
    %25 = vector.extract_strided_slice %23 {offsets = [4, 0], sizes = [1, 256], strides = [1, 1]} : vector<8x256xf32> to vector<1x256xf32>
    %26 = arith.addf %25, %13 : vector<1x256xf32>
    %27 = arith.addf %24, %17 : vector<1x256xf32>
    %cst_8 = arith.constant 1.000000e+00 : f32
    %28 = vector.broadcast %cst_8 : f32 to vector<1x256xf32>
    %29 = arith.addf %26, %28 : vector<1x256xf32>
    %cst_9 = arith.constant 1.600000e+01 : f32
    %30 = vector.broadcast %cst_9 : f32 to vector<1x256xf32>
    %31 = arith.mulf %29, %30 : vector<1x256xf32>
    %cst_10 = arith.constant 1.000000e+00 : f32
    %32 = vector.broadcast %cst_10 : f32 to vector<1x256xf32>
    %33 = arith.subf %31, %32 : vector<1x256xf32>
    %cst_11 = arith.constant 5.000000e-01 : f32
    %34 = vector.broadcast %cst_11 : f32 to vector<1x256xf32>
    %35 = arith.mulf %33, %34 : vector<1x256xf32>
    %cst_12 = arith.constant 1.000000e+00 : f32
    %36 = vector.broadcast %cst_12 : f32 to vector<1x256xf32>
    %37 = arith.addf %27, %36 : vector<1x256xf32>
    %cst_13 = arith.constant 1.600000e+01 : f32
    %38 = vector.broadcast %cst_13 : f32 to vector<1x256xf32>
    %39 = arith.mulf %37, %38 : vector<1x256xf32>
    %cst_14 = arith.constant 1.000000e+00 : f32
    %40 = vector.broadcast %cst_14 : f32 to vector<1x256xf32>
    %41 = arith.subf %39, %40 : vector<1x256xf32>
    %cst_15 = arith.constant 5.000000e-01 : f32
    %42 = vector.broadcast %cst_15 : f32 to vector<1x256xf32>
    %43 = arith.mulf %41, %42 : vector<1x256xf32>
    %44 = vector.broadcast %35 : vector<1x256xf32> to vector<16x256xf32>
    %45 = arith.subf %44, %19 : vector<16x256xf32>
    %46 = math.absf %45 : vector<16x256xf32>
    %cst_16 = arith.constant 1.000000e+00 : f32
    %47 = vector.broadcast %cst_16 : f32 to vector<16x256xf32>
    %48 = arith.subf %47, %46 : vector<16x256xf32>
    %cst_17 = arith.constant 0.000000e+00 : f32
    %49 = vector.broadcast %cst_17 : f32 to vector<16x256xf32>
    %50 = arith.maximumf %49, %48 : vector<16x256xf32>
    %51 = vector.broadcast %43 : vector<1x256xf32> to vector<16x256xf32>
    %52 = arith.subf %51, %21 : vector<16x256xf32>
    %53 = math.absf %52 : vector<16x256xf32>
    %cst_18 = arith.constant 1.000000e+00 : f32
    %54 = vector.broadcast %cst_18 : f32 to vector<16x256xf32>
    %55 = arith.subf %54, %53 : vector<16x256xf32>
    %cst_19 = arith.constant 0.000000e+00 : f32
    %56 = vector.broadcast %cst_19 : f32 to vector<16x256xf32>
    %57 = arith.maximumf %56, %55 : vector<16x256xf32>
    %c0_20 = arith.constant 0 : index
    %c0_21 = arith.constant 0 : index
    %c0_22 = arith.constant 0 : index
    %c0_23 = arith.constant 0 : index
    %58 = vector.load %arg1[%c0_20, %c0_21, %c0_22, %c0_23] : memref<1x4x16x16xf32, #tpu.memory_space<vmem>>, vector<1x1x16x16xf32>
    %59 = vector.shape_cast %58 : vector<1x1x16x16xf32> to vector<16x16xf32>
    %60 = arith.truncf %59 : vector<16x16xf32> to vector<16x16xbf16>
    %61 = arith.truncf %50 : vector<16x256xf32> to vector<16x256xbf16>
    %cst_24 = arith.constant dense<0.000000e+00> : vector<16x256xf32>
    %62 = tpu.matmul %60, %61, %cst_24 {dimension_numbers = #tpu.dot_dimension_numbers<[1], [0], [0], [1], [0, 0, 1, 1], [], []>} : vector<16x16xbf16>, vector<16x256xbf16>, vector<16x256xf32> -> vector<16x256xf32>
    %63 = arith.mulf %57, %62 : vector<16x256xf32>
    %cst_25 = arith.constant dense<0.000000e+00> : vector<256xf32>
    %64 = vector.multi_reduction <add>, %63, %cst_25 [0] : vector<16x256xf32> to vector<256xf32>
    %65 = vector.shape_cast %64 : vector<256xf32> to vector<1x256xf32>
    %c0_26 = arith.constant 0 : index
    %c0_27 = arith.constant 0 : index
    %c0_28 = arith.constant 0 : index
    %66 = vector.load %arg3[%c0_26, %c0_27, %c0_28] : memref<1x4x256xf32, #tpu.memory_space<vmem>>, vector<1x1x256xf32>
    %67 = vector.shape_cast %66 : vector<1x1x256xf32> to vector<1x256xf32>
    %68 = vector.shape_cast %65 : vector<1x256xf32> to vector<1x1x256xf32>
    tpu.vector_store %arg3[%c0_26, %c0_27, %c0_28], %68 {strides = array<i32>} : memref<1x4x256xf32, #tpu.memory_space<vmem>>, vector<1x1x256xf32>,
    %69 = vector.extract_strided_slice %23 {offsets = [1, 0], sizes = [1, 256], strides = [1, 1]} : vector<8x256xf32> to vector<1x256xf32>
    %70 = vector.extract_strided_slice %23 {offsets = [5, 0], sizes = [1, 256], strides = [1, 1]} : vector<8x256xf32> to vector<1x256xf32>
    %71 = arith.addf %70, %13 : vector<1x256xf32>
    %72 = arith.addf %69, %17 : vector<1x256xf32>
    %cst_29 = arith.constant 1.000000e+00 : f32
    %73 = vector.broadcast %cst_29 : f32 to vector<1x256xf32>
    %74 = arith.addf %71, %73 : vector<1x256xf32>
    %cst_30 = arith.constant 1.600000e+01 : f32
    %75 = vector.broadcast %cst_30 : f32 to vector<1x256xf32>
    %76 = arith.mulf %74, %75 : vector<1x256xf32>
    %cst_31 = arith.constant 1.000000e+00 : f32
    %77 = vector.broadcast %cst_31 : f32 to vector<1x256xf32>
    %78 = arith.subf %76, %77 : vector<1x256xf32>
    %cst_32 = arith.constant 5.000000e-01 : f32
    %79 = vector.broadcast %cst_32 : f32 to vector<1x256xf32>
    %80 = arith.mulf %78, %79 : vector<1x256xf32>
    %cst_33 = arith.constant 1.000000e+00 : f32
    %81 = vector.broadcast %cst_33 : f32 to vector<1x256xf32>
    %82 = arith.addf %72, %81 : vector<1x256xf32>
    %cst_34 = arith.constant 1.600000e+01 : f32
    %83 = vector.broadcast %cst_34 : f32 to vector<1x256xf32>
    %84 = arith.mulf %82, %83 : vector<1x256xf32>
    %cst_35 = arith.constant 1.000000e+00 : f32
    %85 = vector.broadcast %cst_35 : f32 to vector<1x256xf32>
    %86 = arith.subf %84, %85 : vector<1x256xf32>
    %cst_36 = arith.constant 5.000000e-01 : f32
    %87 = vector.broadcast %cst_36 : f32 to vector<1x256xf32>
    %88 = arith.mulf %86, %87 : vector<1x256xf32>
    %89 = vector.broadcast %80 : vector<1x256xf32> to vector<16x256xf32>
    %90 = arith.subf %89, %19 : vector<16x256xf32>
    %91 = math.absf %90 : vector<16x256xf32>
    %cst_37 = arith.constant 1.000000e+00 : f32
    %92 = vector.broadcast %cst_37 : f32 to vector<16x256xf32>
    %93 = arith.subf %92, %91 : vector<16x256xf32>
    %cst_38 = arith.constant 0.000000e+00 : f32
    %94 = vector.broadcast %cst_38 : f32 to vector<16x256xf32>
    %95 = arith.maximumf %94, %93 : vector<16x256xf32>
    %96 = vector.broadcast %88 : vector<1x256xf32> to vector<16x256xf32>
    %97 = arith.subf %96, %21 : vector<16x256xf32>
    %98 = math.absf %97 : vector<16x256xf32>
    %cst_39 = arith.constant 1.000000e+00 : f32
    %99 = vector.broadcast %cst_39 : f32 to vector<16x256xf32>
    %100 = arith.subf %99, %98 : vector<16x256xf32>
    %cst_40 = arith.constant 0.000000e+00 : f32
    %101 = vector.broadcast %cst_40 : f32 to vector<16x256xf32>
    %102 = arith.maximumf %101, %100 : vector<16x256xf32>
    %c0_41 = arith.constant 0 : index
    %c1 = arith.constant 1 : index
    %c0_42 = arith.constant 0 : index
    %c0_43 = arith.constant 0 : index
    %103 = vector.load %arg1[%c0_41, %c1, %c0_42, %c0_43] : memref<1x4x16x16xf32, #tpu.memory_space<vmem>>, vector<1x1x16x16xf32>
    %104 = vector.shape_cast %103 : vector<1x1x16x16xf32> to vector<16x16xf32>
    %105 = arith.truncf %104 : vector<16x16xf32> to vector<16x16xbf16>
    %106 = arith.truncf %95 : vector<16x256xf32> to vector<16x256xbf16>
    %cst_44 = arith.constant dense<0.000000e+00> : vector<16x256xf32>
    %107 = tpu.matmul %105, %106, %cst_44 {dimension_numbers = #tpu.dot_dimension_numbers<[1], [0], [0], [1], [0, 0, 1, 1], [], []>} : vector<16x16xbf16>, vector<16x256xbf16>, vector<16x256xf32> -> vector<16x256xf32>
    %108 = arith.mulf %102, %107 : vector<16x256xf32>
    %cst_45 = arith.constant dense<0.000000e+00> : vector<256xf32>
    %109 = vector.multi_reduction <add>, %108, %cst_45 [0] : vector<16x256xf32> to vector<256xf32>
    %110 = vector.shape_cast %109 : vector<256xf32> to vector<1x256xf32>
    %c0_46 = arith.constant 0 : index
    %c1_47 = arith.constant 1 : index
    %c0_48 = arith.constant 0 : index
    %111 = vector.load %arg3[%c0_46, %c1_47, %c0_48] : memref<1x4x256xf32, #tpu.memory_space<vmem>>, vector<1x1x256xf32>
    %112 = vector.shape_cast %111 : vector<1x1x256xf32> to vector<1x256xf32>
    %113 = vector.shape_cast %110 : vector<1x256xf32> to vector<1x1x256xf32>
    tpu.vector_store %arg3[%c0_46, %c1_47, %c0_48], %113 {strides = array<i32>} : memref<1x4x256xf32, #tpu.memory_space<vmem>>, vector<1x1x256xf32>,
    %114 = vector.extract_strided_slice %23 {offsets = [2, 0], sizes = [1, 256], strides = [1, 1]} : vector<8x256xf32> to vector<1x256xf32>
    %115 = vector.extract_strided_slice %23 {offsets = [6, 0], sizes = [1, 256], strides = [1, 1]} : vector<8x256xf32> to vector<1x256xf32>
    %116 = arith.addf %115, %13 : vector<1x256xf32>
    %117 = arith.addf %114, %17 : vector<1x256xf32>
    %cst_49 = arith.constant 1.000000e+00 : f32
    %118 = vector.broadcast %cst_49 : f32 to vector<1x256xf32>
    %119 = arith.addf %116, %118 : vector<1x256xf32>
    %cst_50 = arith.constant 1.600000e+01 : f32
    %120 = vector.broadcast %cst_50 : f32 to vector<1x256xf32>
    %121 = arith.mulf %119, %120 : vector<1x256xf32>
    %cst_51 = arith.constant 1.000000e+00 : f32
    %122 = vector.broadcast %cst_51 : f32 to vector<1x256xf32>
    %123 = arith.subf %121, %122 : vector<1x256xf32>
    %cst_52 = arith.constant 5.000000e-01 : f32
    %124 = vector.broadcast %cst_52 : f32 to vector<1x256xf32>
    %125 = arith.mulf %123, %124 : vector<1x256xf32>
    %cst_53 = arith.constant 1.000000e+00 : f32
    %126 = vector.broadcast %cst_53 : f32 to vector<1x256xf32>
    %127 = arith.addf %117, %126 : vector<1x256xf32>
    %cst_54 = arith.constant 1.600000e+01 : f32
    %128 = vector.broadcast %cst_54 : f32 to vector<1x256xf32>
    %129 = arith.mulf %127, %128 : vector<1x256xf32>
    %cst_55 = arith.constant 1.000000e+00 : f32
    %130 = vector.broadcast %cst_55 : f32 to vector<1x256xf32>
    %131 = arith.subf %129, %130 : vector<1x256xf32>
    %cst_56 = arith.constant 5.000000e-01 : f32
    %132 = vector.broadcast %cst_56 : f32 to vector<1x256xf32>
    %133 = arith.mulf %131, %132 : vector<1x256xf32>
    %134 = vector.broadcast %125 : vector<1x256xf32> to vector<16x256xf32>
    %135 = arith.subf %134, %19 : vector<16x256xf32>
    %136 = math.absf %135 : vector<16x256xf32>
    %cst_57 = arith.constant 1.000000e+00 : f32
    %137 = vector.broadcast %cst_57 : f32 to vector<16x256xf32>
    %138 = arith.subf %137, %136 : vector<16x256xf32>
    %cst_58 = arith.constant 0.000000e+00 : f32
    %139 = vector.broadcast %cst_58 : f32 to vector<16x256xf32>
    %140 = arith.maximumf %139, %138 : vector<16x256xf32>
    %141 = vector.broadcast %133 : vector<1x256xf32> to vector<16x256xf32>
    %142 = arith.subf %141, %21 : vector<16x256xf32>
    %143 = math.absf %142 : vector<16x256xf32>
    %cst_59 = arith.constant 1.000000e+00 : f32
    %144 = vector.broadcast %cst_59 : f32 to vector<16x256xf32>
    %145 = arith.subf %144, %143 : vector<16x256xf32>
    %cst_60 = arith.constant 0.000000e+00 : f32
    %146 = vector.broadcast %cst_60 : f32 to vector<16x256xf32>
    %147 = arith.maximumf %146, %145 : vector<16x256xf32>
    %c0_61 = arith.constant 0 : index
    %c2 = arith.constant 2 : index
    %c0_62 = arith.constant 0 : index
    %c0_63 = arith.constant 0 : index
    %148 = vector.load %arg1[%c0_61, %c2, %c0_62, %c0_63] : memref<1x4x16x16xf32, #tpu.memory_space<vmem>>, vector<1x1x16x16xf32>
    %149 = vector.shape_cast %148 : vector<1x1x16x16xf32> to vector<16x16xf32>
    %150 = arith.truncf %149 : vector<16x16xf32> to vector<16x16xbf16>
    %151 = arith.truncf %140 : vector<16x256xf32> to vector<16x256xbf16>
    %cst_64 = arith.constant dense<0.000000e+00> : vector<16x256xf32>
    %152 = tpu.matmul %150, %151, %cst_64 {dimension_numbers = #tpu.dot_dimension_numbers<[1], [0], [0], [1], [0, 0, 1, 1], [], []>} : vector<16x16xbf16>, vector<16x256xbf16>, vector<16x256xf32> -> vector<16x256xf32>
    %153 = arith.mulf %147, %152 : vector<16x256xf32>
    %cst_65 = arith.constant dense<0.000000e+00> : vector<256xf32>
    %154 = vector.multi_reduction <add>, %153, %cst_65 [0] : vector<16x256xf32> to vector<256xf32>
    %155 = vector.shape_cast %154 : vector<256xf32> to vector<1x256xf32>
    %c0_66 = arith.constant 0 : index
    %c2_67 = arith.constant 2 : index
    %c0_68 = arith.constant 0 : index
    %156 = vector.load %arg3[%c0_66, %c2_67, %c0_68] : memref<1x4x256xf32, #tpu.memory_space<vmem>>, vector<1x1x256xf32>
    %157 = vector.shape_cast %156 : vector<1x1x256xf32> to vector<1x256xf32>
    %158 = vector.shape_cast %155 : vector<1x256xf32> to vector<1x1x256xf32>
    tpu.vector_store %arg3[%c0_66, %c2_67, %c0_68], %158 {strides = array<i32>} : memref<1x4x256xf32, #tpu.memory_space<vmem>>, vector<1x1x256xf32>,
    %159 = vector.extract_strided_slice %23 {offsets = [3, 0], sizes = [1, 256], strides = [1, 1]} : vector<8x256xf32> to vector<1x256xf32>
    %160 = vector.extract_strided_slice %23 {offsets = [7, 0], sizes = [1, 256], strides = [1, 1]} : vector<8x256xf32> to vector<1x256xf32>
    %161 = arith.addf %160, %13 : vector<1x256xf32>
    %162 = arith.addf %159, %17 : vector<1x256xf32>
    %cst_69 = arith.constant 1.000000e+00 : f32
    %163 = vector.broadcast %cst_69 : f32 to vector<1x256xf32>
    %164 = arith.addf %161, %163 : vector<1x256xf32>
    %cst_70 = arith.constant 1.600000e+01 : f32
    %165 = vector.broadcast %cst_70 : f32 to vector<1x256xf32>
    %166 = arith.mulf %164, %165 : vector<1x256xf32>
    %cst_71 = arith.constant 1.000000e+00 : f32
    %167 = vector.broadcast %cst_71 : f32 to vector<1x256xf32>
    %168 = arith.subf %166, %167 : vector<1x256xf32>
    %cst_72 = arith.constant 5.000000e-01 : f32
    %169 = vector.broadcast %cst_72 : f32 to vector<1x256xf32>
    %170 = arith.mulf %168, %169 : vector<1x256xf32>
    %cst_73 = arith.constant 1.000000e+00 : f32
    %171 = vector.broadcast %cst_73 : f32 to vector<1x256xf32>
    %172 = arith.addf %162, %171 : vector<1x256xf32>
    %cst_74 = arith.constant 1.600000e+01 : f32
    %173 = vector.broadcast %cst_74 : f32 to vector<1x256xf32>
    %174 = arith.mulf %172, %173 : vector<1x256xf32>
    %cst_75 = arith.constant 1.000000e+00 : f32
    %175 = vector.broadcast %cst_75 : f32 to vector<1x256xf32>
    %176 = arith.subf %174, %175 : vector<1x256xf32>
    %cst_76 = arith.constant 5.000000e-01 : f32
    %177 = vector.broadcast %cst_76 : f32 to vector<1x256xf32>
    %178 = arith.mulf %176, %177 : vector<1x256xf32>
    %179 = vector.broadcast %170 : vector<1x256xf32> to vector<16x256xf32>
    %180 = arith.subf %179, %19 : vector<16x256xf32>
    %181 = math.absf %180 : vector<16x256xf32>
    %cst_77 = arith.constant 1.000000e+00 : f32
    %182 = vector.broadcast %cst_77 : f32 to vector<16x256xf32>
    %183 = arith.subf %182, %181 : vector<16x256xf32>
    %cst_78 = arith.constant 0.000000e+00 : f32
    %184 = vector.broadcast %cst_78 : f32 to vector<16x256xf32>
    %185 = arith.maximumf %184, %183 : vector<16x256xf32>
    %186 = vector.broadcast %178 : vector<1x256xf32> to vector<16x256xf32>
    %187 = arith.subf %186, %21 : vector<16x256xf32>
    %188 = math.absf %187 : vector<16x256xf32>
    %cst_79 = arith.constant 1.000000e+00 : f32
    %189 = vector.broadcast %cst_79 : f32 to vector<16x256xf32>
    %190 = arith.subf %189, %188 : vector<16x256xf32>
    %cst_80 = arith.constant 0.000000e+00 : f32
    %191 = vector.broadcast %cst_80 : f32 to vector<16x256xf32>
    %192 = arith.maximumf %191, %190 : vector<16x256xf32>
    %c0_81 = arith.constant 0 : index
    %c3 = arith.constant 3 : index
    %c0_82 = arith.constant 0 : index
    %c0_83 = arith.constant 0 : index
    %193 = vector.load %arg1[%c0_81, %c3, %c0_82, %c0_83] : memref<1x4x16x16xf32, #tpu.memory_space<vmem>>, vector<1x1x16x16xf32>
    %194 = vector.shape_cast %193 : vector<1x1x16x16xf32> to vector<16x16xf32>
    %195 = arith.truncf %194 : vector<16x16xf32> to vector<16x16xbf16>
    %196 = arith.truncf %185 : vector<16x256xf32> to vector<16x256xbf16>
    %cst_84 = arith.constant dense<0.000000e+00> : vector<16x256xf32>
    %197 = tpu.matmul %195, %196, %cst_84 {dimension_numbers = #tpu.dot_dimension_numbers<[1], [0], [0], [1], [0, 0, 1, 1], [], []>} : vector<16x16xbf16>, vector<16x256xbf16>, vector<16x256xf32> -> vector<16x256xf32>
    %198 = arith.mulf %192, %197 : vector<16x256xf32>
    %cst_85 = arith.constant dense<0.000000e+00> : vector<256xf32>
    %199 = vector.multi_reduction <add>, %198, %cst_85 [0] : vector<16x256xf32> to vector<256xf32>
    %200 = vector.shape_cast %199 : vector<256xf32> to vector<1x256xf32>
    %c0_86 = arith.constant 0 : index
    %c3_87 = arith.constant 3 : index
    %c0_88 = arith.constant 0 : index
    %201 = vector.load %arg3[%c0_86, %c3_87, %c0_88] : memref<1x4x256xf32, #tpu.memory_space<vmem>>, vector<1x1x256xf32>
    %202 = vector.shape_cast %201 : vector<1x1x256xf32> to vector<1x256xf32>
    %203 = vector.shape_cast %200 : vector<1x256xf32> to vector<1x1x256xf32>
    tpu.vector_store %arg3[%c0_86, %c3_87, %c0_88], %203 {strides = array<i32>} : memref<1x4x256xf32, #tpu.memory_space<vmem>>, vector<1x1x256xf32>,
    return
  }
  func.func @transform_0(%arg0: i32) -> (i32, i32, i32, i32) {
    %c0_i32 = arith.constant 0 : i32
    %c0_i32_0 = arith.constant 0 : i32
    %c0_i32_1 = arith.constant 0 : i32
    %c0_i32_2 = arith.constant 0 : i32
    return %arg0, %c0_i32, %c0_i32_0, %c0_i32_1 : i32, i32, i32, i32
  }
  func.func @transform_1(%arg0: i32) -> (i32, i32, i32) {
    %c0_i32 = arith.constant 0 : i32
    %c0_i32_0 = arith.constant 0 : i32
    %c0_i32_1 = arith.constant 0 : i32
    return %arg0, %c0_i32, %c0_i32_0 : i32, i32, i32
  }
  func.func @transform_2(%arg0: i32) -> (i32, i32, i32) {
    %c0_i32 = arith.constant 0 : i32
    %c0_i32_0 = arith.constant 0 : i32
    %c0_i32_1 = arith.constant 0 : i32
    return %arg0, %c0_i32, %c0_i32_0 : i32, i32, i32
  }
}

module attributes {stable_mosaic.version = 11 : i64} {
  func.func @_conv3x3_kernel(%arg0: i32, %arg1: memref<1x4x256xf32, #tpu.memory_space<vmem>>, %arg2: memref<9x8x4xbf16, #tpu.memory_space<vmem>>, %arg3: memref<8x1xf32, #tpu.memory_space<vmem>>, %arg4: memref<1x8x256xf32, #tpu.memory_space<vmem>>) attributes {dimension_semantics = [#tpu.dimension_semantics<parallel>], iteration_bounds = array<i64: 2>, scalar_prefetch = 0 : i64, scratch_operands = 0 : i64, tpu.core_type = #tpu.core_type<tc>, window_params = [{transform_indices = @transform_0, window_bounds = array<i64: 1, 4, 256>}, {pipeline_mode = #tpu.pipeline_mode<synchronous>, transform_indices = @transform_1, window_bounds = array<i64: 9, 8, 4>}, {pipeline_mode = #tpu.pipeline_mode<synchronous>, transform_indices = @transform_2, window_bounds = array<i64: 8, 1>}, {transform_indices = @transform_3, window_bounds = array<i64: 1, 8, 256>}]} {
    %c0 = arith.constant 0 : index
    %c0_0 = arith.constant 0 : index
    %c0_1 = arith.constant 0 : index
    %0 = vector.load %arg1[%c0, %c0_0, %c0_1] : memref<1x4x256xf32, #tpu.memory_space<vmem>>, vector<1x4x256xf32>
    %1 = vector.shape_cast %0 : vector<1x4x256xf32> to vector<4x256xf32>
    %2 = tpu.iota {dimensions = array<i32: 1>} : vector<1x256xi32>
    %3 = arith.sitofp %2 : vector<1x256xi32> to vector<1x256xf32>
    %cst = arith.constant 5.000000e-01 : f32
    %4 = vector.broadcast %cst : f32 to vector<1x256xf32>
    %5 = arith.addf %3, %4 : vector<1x256xf32>
    %cst_2 = arith.constant 6.250000e-02 : f32
    %6 = vector.broadcast %cst_2 : f32 to vector<1x256xf32>
    %7 = arith.mulf %5, %6 : vector<1x256xf32>
    %8 = math.floor %7 : vector<1x256xf32>
    %cst_3 = arith.constant 1.600000e+01 : f32
    %9 = vector.broadcast %cst_3 : f32 to vector<1x256xf32>
    %10 = arith.mulf %8, %9 : vector<1x256xf32>
    %11 = arith.subf %3, %10 : vector<1x256xf32>
    %cst_4 = arith.constant 0.000000e+00 : f32
    %12 = vector.broadcast %cst_4 : f32 to vector<8x256xf32>
    %c17_i32 = arith.constant 17 : i32
    %13 = tpu.dynamic_rotate %1 by %c17_i32 dim 1 : vector<4x256xf32>, i32 -> vector<4x256xf32>
    %cst_5 = arith.constant 1.000000e+00 : f32
    %14 = vector.broadcast %cst_5 : f32 to vector<1x256xf32>
    %15 = arith.cmpf oge, %8, %14 : vector<1x256xf32>
    %cst_6 = arith.constant 1.000000e+00 : f32
    %16 = vector.broadcast %cst_6 : f32 to vector<1x256xf32>
    %17 = arith.cmpf oge, %11, %16 : vector<1x256xf32>
    %18 = arith.andi %15, %17 : vector<1x256xi1>
    %cst_7 = arith.constant 0.000000e+00 : f32
    %19 = vector.broadcast %cst_7 : f32 to vector<4x256xf32>
    %20 = vector.shape_cast %18 : vector<1x256xi1> to vector<1x256xi1>
    %21 = vector.broadcast %20 : vector<1x256xi1> to vector<4x256xi1>
    %22 = arith.select %21, %13, %19 : vector<4x256xi1>, vector<4x256xf32>
    %c0_8 = arith.constant 0 : index
    %c0_9 = arith.constant 0 : index
    %c0_10 = arith.constant 0 : index
    %23 = vector.load %arg2[%c0_8, %c0_9, %c0_10] : memref<9x8x4xbf16, #tpu.memory_space<vmem>>, vector<1x8x4xbf16>
    %24 = vector.shape_cast %23 : vector<1x8x4xbf16> to vector<8x4xbf16>
    %25 = arith.truncf %22 : vector<4x256xf32> to vector<4x256xbf16>
    %cst_11 = arith.constant dense<0.000000e+00> : vector<8x256xf32>
    %26 = tpu.matmul %24, %25, %cst_11 {dimension_numbers = #tpu.dot_dimension_numbers<[1], [0], [0], [1], [0, 0, 1, 1], [], []>} : vector<8x4xbf16>, vector<4x256xbf16>, vector<8x256xf32> -> vector<8x256xf32>
    %27 = arith.addf %12, %26 : vector<8x256xf32>
    %c16_i32 = arith.constant 16 : i32
    %28 = tpu.dynamic_rotate %1 by %c16_i32 dim 1 : vector<4x256xf32>, i32 -> vector<4x256xf32>
    %cst_12 = arith.constant 1.000000e+00 : f32
    %29 = vector.broadcast %cst_12 : f32 to vector<1x256xf32>
    %30 = arith.cmpf oge, %8, %29 : vector<1x256xf32>
    %cst_13 = arith.constant 0.000000e+00 : f32
    %31 = vector.broadcast %cst_13 : f32 to vector<4x256xf32>
    %32 = vector.shape_cast %30 : vector<1x256xi1> to vector<1x256xi1>
    %33 = vector.broadcast %32 : vector<1x256xi1> to vector<4x256xi1>
    %34 = arith.select %33, %28, %31 : vector<4x256xi1>, vector<4x256xf32>
    %c1 = arith.constant 1 : index
    %c0_14 = arith.constant 0 : index
    %c0_15 = arith.constant 0 : index
    %35 = vector.load %arg2[%c1, %c0_14, %c0_15] : memref<9x8x4xbf16, #tpu.memory_space<vmem>>, vector<1x8x4xbf16>
    %36 = vector.shape_cast %35 : vector<1x8x4xbf16> to vector<8x4xbf16>
    %37 = arith.truncf %34 : vector<4x256xf32> to vector<4x256xbf16>
    %cst_16 = arith.constant dense<0.000000e+00> : vector<8x256xf32>
    %38 = tpu.matmul %36, %37, %cst_16 {dimension_numbers = #tpu.dot_dimension_numbers<[1], [0], [0], [1], [0, 0, 1, 1], [], []>} : vector<8x4xbf16>, vector<4x256xbf16>, vector<8x256xf32> -> vector<8x256xf32>
    %39 = arith.addf %27, %38 : vector<8x256xf32>
    %c15_i32 = arith.constant 15 : i32
    %40 = tpu.dynamic_rotate %1 by %c15_i32 dim 1 : vector<4x256xf32>, i32 -> vector<4x256xf32>
    %cst_17 = arith.constant 1.000000e+00 : f32
    %41 = vector.broadcast %cst_17 : f32 to vector<1x256xf32>
    %42 = arith.cmpf oge, %8, %41 : vector<1x256xf32>
    %cst_18 = arith.constant 1.400000e+01 : f32
    %43 = vector.broadcast %cst_18 : f32 to vector<1x256xf32>
    %44 = arith.cmpf ole, %11, %43 : vector<1x256xf32>
    %45 = arith.andi %42, %44 : vector<1x256xi1>
    %cst_19 = arith.constant 0.000000e+00 : f32
    %46 = vector.broadcast %cst_19 : f32 to vector<4x256xf32>
    %47 = vector.shape_cast %45 : vector<1x256xi1> to vector<1x256xi1>
    %48 = vector.broadcast %47 : vector<1x256xi1> to vector<4x256xi1>
    %49 = arith.select %48, %40, %46 : vector<4x256xi1>, vector<4x256xf32>
    %c2 = arith.constant 2 : index
    %c0_20 = arith.constant 0 : index
    %c0_21 = arith.constant 0 : index
    %50 = vector.load %arg2[%c2, %c0_20, %c0_21] : memref<9x8x4xbf16, #tpu.memory_space<vmem>>, vector<1x8x4xbf16>
    %51 = vector.shape_cast %50 : vector<1x8x4xbf16> to vector<8x4xbf16>
    %52 = arith.truncf %49 : vector<4x256xf32> to vector<4x256xbf16>
    %cst_22 = arith.constant dense<0.000000e+00> : vector<8x256xf32>
    %53 = tpu.matmul %51, %52, %cst_22 {dimension_numbers = #tpu.dot_dimension_numbers<[1], [0], [0], [1], [0, 0, 1, 1], [], []>} : vector<8x4xbf16>, vector<4x256xbf16>, vector<8x256xf32> -> vector<8x256xf32>
    %54 = arith.addf %39, %53 : vector<8x256xf32>
    %c1_i32 = arith.constant 1 : i32
    %55 = tpu.dynamic_rotate %1 by %c1_i32 dim 1 : vector<4x256xf32>, i32 -> vector<4x256xf32>
    %cst_23 = arith.constant 1.000000e+00 : f32
    %56 = vector.broadcast %cst_23 : f32 to vector<1x256xf32>
    %57 = arith.cmpf oge, %11, %56 : vector<1x256xf32>
    %cst_24 = arith.constant 0.000000e+00 : f32
    %58 = vector.broadcast %cst_24 : f32 to vector<4x256xf32>
    %59 = vector.shape_cast %57 : vector<1x256xi1> to vector<1x256xi1>
    %60 = vector.broadcast %59 : vector<1x256xi1> to vector<4x256xi1>
    %61 = arith.select %60, %55, %58 : vector<4x256xi1>, vector<4x256xf32>
    %c3 = arith.constant 3 : index
    %c0_25 = arith.constant 0 : index
    %c0_26 = arith.constant 0 : index
    %62 = vector.load %arg2[%c3, %c0_25, %c0_26] : memref<9x8x4xbf16, #tpu.memory_space<vmem>>, vector<1x8x4xbf16>
    %63 = vector.shape_cast %62 : vector<1x8x4xbf16> to vector<8x4xbf16>
    %64 = arith.truncf %61 : vector<4x256xf32> to vector<4x256xbf16>
    %cst_27 = arith.constant dense<0.000000e+00> : vector<8x256xf32>
    %65 = tpu.matmul %63, %64, %cst_27 {dimension_numbers = #tpu.dot_dimension_numbers<[1], [0], [0], [1], [0, 0, 1, 1], [], []>} : vector<8x4xbf16>, vector<4x256xbf16>, vector<8x256xf32> -> vector<8x256xf32>
    %66 = arith.addf %54, %65 : vector<8x256xf32>
    %c4 = arith.constant 4 : index
    %c0_28 = arith.constant 0 : index
    %c0_29 = arith.constant 0 : index
    %67 = vector.load %arg2[%c4, %c0_28, %c0_29] : memref<9x8x4xbf16, #tpu.memory_space<vmem>>, vector<1x8x4xbf16>
    %68 = vector.shape_cast %67 : vector<1x8x4xbf16> to vector<8x4xbf16>
    %69 = arith.truncf %1 : vector<4x256xf32> to vector<4x256xbf16>
    %cst_30 = arith.constant dense<0.000000e+00> : vector<8x256xf32>
    %70 = tpu.matmul %68, %69, %cst_30 {dimension_numbers = #tpu.dot_dimension_numbers<[1], [0], [0], [1], [0, 0, 1, 1], [], []>} : vector<8x4xbf16>, vector<4x256xbf16>, vector<8x256xf32> -> vector<8x256xf32>
    %71 = arith.addf %66, %70 : vector<8x256xf32>
    %c255_i32 = arith.constant 255 : i32
    %72 = tpu.dynamic_rotate %1 by %c255_i32 dim 1 : vector<4x256xf32>, i32 -> vector<4x256xf32>
    %cst_31 = arith.constant 1.400000e+01 : f32
    %73 = vector.broadcast %cst_31 : f32 to vector<1x256xf32>
    %74 = arith.cmpf ole, %11, %73 : vector<1x256xf32>
    %cst_32 = arith.constant 0.000000e+00 : f32
    %75 = vector.broadcast %cst_32 : f32 to vector<4x256xf32>
    %76 = vector.shape_cast %74 : vector<1x256xi1> to vector<1x256xi1>
    %77 = vector.broadcast %76 : vector<1x256xi1> to vector<4x256xi1>
    %78 = arith.select %77, %72, %75 : vector<4x256xi1>, vector<4x256xf32>
    %c5 = arith.constant 5 : index
    %c0_33 = arith.constant 0 : index
    %c0_34 = arith.constant 0 : index
    %79 = vector.load %arg2[%c5, %c0_33, %c0_34] : memref<9x8x4xbf16, #tpu.memory_space<vmem>>, vector<1x8x4xbf16>
    %80 = vector.shape_cast %79 : vector<1x8x4xbf16> to vector<8x4xbf16>
    %81 = arith.truncf %78 : vector<4x256xf32> to vector<4x256xbf16>
    %cst_35 = arith.constant dense<0.000000e+00> : vector<8x256xf32>
    %82 = tpu.matmul %80, %81, %cst_35 {dimension_numbers = #tpu.dot_dimension_numbers<[1], [0], [0], [1], [0, 0, 1, 1], [], []>} : vector<8x4xbf16>, vector<4x256xbf16>, vector<8x256xf32> -> vector<8x256xf32>
    %83 = arith.addf %71, %82 : vector<8x256xf32>
    %c241_i32 = arith.constant 241 : i32
    %84 = tpu.dynamic_rotate %1 by %c241_i32 dim 1 : vector<4x256xf32>, i32 -> vector<4x256xf32>
    %cst_36 = arith.constant 1.400000e+01 : f32
    %85 = vector.broadcast %cst_36 : f32 to vector<1x256xf32>
    %86 = arith.cmpf ole, %8, %85 : vector<1x256xf32>
    %cst_37 = arith.constant 1.000000e+00 : f32
    %87 = vector.broadcast %cst_37 : f32 to vector<1x256xf32>
    %88 = arith.cmpf oge, %11, %87 : vector<1x256xf32>
    %89 = arith.andi %86, %88 : vector<1x256xi1>
    %cst_38 = arith.constant 0.000000e+00 : f32
    %90 = vector.broadcast %cst_38 : f32 to vector<4x256xf32>
    %91 = vector.shape_cast %89 : vector<1x256xi1> to vector<1x256xi1>
    %92 = vector.broadcast %91 : vector<1x256xi1> to vector<4x256xi1>
    %93 = arith.select %92, %84, %90 : vector<4x256xi1>, vector<4x256xf32>
    %c6 = arith.constant 6 : index
    %c0_39 = arith.constant 0 : index
    %c0_40 = arith.constant 0 : index
    %94 = vector.load %arg2[%c6, %c0_39, %c0_40] : memref<9x8x4xbf16, #tpu.memory_space<vmem>>, vector<1x8x4xbf16>
    %95 = vector.shape_cast %94 : vector<1x8x4xbf16> to vector<8x4xbf16>
    %96 = arith.truncf %93 : vector<4x256xf32> to vector<4x256xbf16>
    %cst_41 = arith.constant dense<0.000000e+00> : vector<8x256xf32>
    %97 = tpu.matmul %95, %96, %cst_41 {dimension_numbers = #tpu.dot_dimension_numbers<[1], [0], [0], [1], [0, 0, 1, 1], [], []>} : vector<8x4xbf16>, vector<4x256xbf16>, vector<8x256xf32> -> vector<8x256xf32>
    %98 = arith.addf %83, %97 : vector<8x256xf32>
    %c240_i32 = arith.constant 240 : i32
    %99 = tpu.dynamic_rotate %1 by %c240_i32 dim 1 : vector<4x256xf32>, i32 -> vector<4x256xf32>
    %cst_42 = arith.constant 1.400000e+01 : f32
    %100 = vector.broadcast %cst_42 : f32 to vector<1x256xf32>
    %101 = arith.cmpf ole, %8, %100 : vector<1x256xf32>
    %cst_43 = arith.constant 0.000000e+00 : f32
    %102 = vector.broadcast %cst_43 : f32 to vector<4x256xf32>
    %103 = vector.shape_cast %101 : vector<1x256xi1> to vector<1x256xi1>
    %104 = vector.broadcast %103 : vector<1x256xi1> to vector<4x256xi1>
    %105 = arith.select %104, %99, %102 : vector<4x256xi1>, vector<4x256xf32>
    %c7 = arith.constant 7 : index
    %c0_44 = arith.constant 0 : index
    %c0_45 = arith.constant 0 : index
    %106 = vector.load %arg2[%c7, %c0_44, %c0_45] : memref<9x8x4xbf16, #tpu.memory_space<vmem>>, vector<1x8x4xbf16>
    %107 = vector.shape_cast %106 : vector<1x8x4xbf16> to vector<8x4xbf16>
    %108 = arith.truncf %105 : vector<4x256xf32> to vector<4x256xbf16>
    %cst_46 = arith.constant dense<0.000000e+00> : vector<8x256xf32>
    %109 = tpu.matmul %107, %108, %cst_46 {dimension_numbers = #tpu.dot_dimension_numbers<[1], [0], [0], [1], [0, 0, 1, 1], [], []>} : vector<8x4xbf16>, vector<4x256xbf16>, vector<8x256xf32> -> vector<8x256xf32>
    %110 = arith.addf %98, %109 : vector<8x256xf32>
    %c239_i32 = arith.constant 239 : i32
    %111 = tpu.dynamic_rotate %1 by %c239_i32 dim 1 : vector<4x256xf32>, i32 -> vector<4x256xf32>
    %cst_47 = arith.constant 1.400000e+01 : f32
    %112 = vector.broadcast %cst_47 : f32 to vector<1x256xf32>
    %113 = arith.cmpf ole, %8, %112 : vector<1x256xf32>
    %cst_48 = arith.constant 1.400000e+01 : f32
    %114 = vector.broadcast %cst_48 : f32 to vector<1x256xf32>
    %115 = arith.cmpf ole, %11, %114 : vector<1x256xf32>
    %116 = arith.andi %113, %115 : vector<1x256xi1>
    %cst_49 = arith.constant 0.000000e+00 : f32
    %117 = vector.broadcast %cst_49 : f32 to vector<4x256xf32>
    %118 = vector.shape_cast %116 : vector<1x256xi1> to vector<1x256xi1>
    %119 = vector.broadcast %118 : vector<1x256xi1> to vector<4x256xi1>
    %120 = arith.select %119, %111, %117 : vector<4x256xi1>, vector<4x256xf32>
    %c8 = arith.constant 8 : index
    %c0_50 = arith.constant 0 : index
    %c0_51 = arith.constant 0 : index
    %121 = vector.load %arg2[%c8, %c0_50, %c0_51] : memref<9x8x4xbf16, #tpu.memory_space<vmem>>, vector<1x8x4xbf16>
    %122 = vector.shape_cast %121 : vector<1x8x4xbf16> to vector<8x4xbf16>
    %123 = arith.truncf %120 : vector<4x256xf32> to vector<4x256xbf16>
    %cst_52 = arith.constant dense<0.000000e+00> : vector<8x256xf32>
    %124 = tpu.matmul %122, %123, %cst_52 {dimension_numbers = #tpu.dot_dimension_numbers<[1], [0], [0], [1], [0, 0, 1, 1], [], []>} : vector<8x4xbf16>, vector<4x256xbf16>, vector<8x256xf32> -> vector<8x256xf32>
    %125 = arith.addf %110, %124 : vector<8x256xf32>
    %c0_53 = arith.constant 0 : index
    %c0_54 = arith.constant 0 : index
    %126 = vector.load %arg3[%c0_53, %c0_54] : memref<8x1xf32, #tpu.memory_space<vmem>>, vector<8x1xf32>
    %127 = vector.broadcast %126 : vector<8x1xf32> to vector<8x256xf32>
    %128 = arith.addf %125, %127 : vector<8x256xf32>
    %c0_55 = arith.constant 0 : index
    %c0_56 = arith.constant 0 : index
    %c0_57 = arith.constant 0 : index
    %129 = vector.load %arg4[%c0_55, %c0_56, %c0_57] : memref<1x8x256xf32, #tpu.memory_space<vmem>>, vector<1x8x256xf32>
    %130 = vector.shape_cast %129 : vector<1x8x256xf32> to vector<8x256xf32>
    %131 = vector.shape_cast %128 : vector<8x256xf32> to vector<1x8x256xf32>
    tpu.vector_store %arg4[%c0_55, %c0_56, %c0_57], %131 {strides = array<i32>} : memref<1x8x256xf32, #tpu.memory_space<vmem>>, vector<1x8x256xf32>,
    return
  }
  func.func @transform_0(%arg0: i32) -> (i32, i32, i32) {
    %c0_i32 = arith.constant 0 : i32
    %c0_i32_0 = arith.constant 0 : i32
    %c0_i32_1 = arith.constant 0 : i32
    return %arg0, %c0_i32, %c0_i32_0 : i32, i32, i32
  }
  func.func @transform_1(%arg0: i32) -> (i32, i32, i32) {
    %c0_i32 = arith.constant 0 : i32
    %c0_i32_0 = arith.constant 0 : i32
    %c0_i32_1 = arith.constant 0 : i32
    %c0_i32_2 = arith.constant 0 : i32
    return %c0_i32, %c0_i32_0, %c0_i32_1 : i32, i32, i32
  }
  func.func @transform_2(%arg0: i32) -> (i32, i32) {
    %c0_i32 = arith.constant 0 : i32
    %c0_i32_0 = arith.constant 0 : i32
    %c0_i32_1 = arith.constant 0 : i32
    return %c0_i32, %c0_i32_0 : i32, i32
  }
  func.func @transform_3(%arg0: i32) -> (i32, i32, i32) {
    %c0_i32 = arith.constant 0 : i32
    %c0_i32_0 = arith.constant 0 : i32
    %c0_i32_1 = arith.constant 0 : i32
    return %arg0, %c0_i32, %c0_i32_0 : i32, i32, i32
  }
}

</mosaic_0001>

<bundles_post_ra>
// kernel: conv2d_deformable_forward.4
= control target key start
LH: loop header
LB: loop body
LE: loop exit
PB: predicated region body
PF: predicated region fallthrough
CT: control target
= control target key end

     0   :  { %s750_s9 = smov 0   ;;  %s927_s0 = inlined_call_operand.vmem [shape: f32[2,4,16,16], index: 0, kind: input, shape index: {}]   ;;  %s928_s1 = inlined_call_operand.vmem [shape: f32[2,8,256], index: 1, kind: input, shape index: {}]   ;;  %s929_s2 = inlined_call_operand.vmem [shape: f32[2,4,256], index: 2, kind: output, shape index: {}]  }
   0x1 LB: > { %s678_s10 = sadd.s32 4294967295, %s733_s9   ;;  %p682_p0 = scmp.ge.s32.totalorder %s733_s9, 1  ;;  %s733_s9 = sphi %s750_s9, %s12_s9  }
   0x2   : > { %p122_p1 = scmp.lt.s32.totalorder %s733_s9, 3 }
   0x4   : > { %p123_p2 = pnand %p682_p0, %p122_p1 }
   0x5   : > { %p149_p3 = scmp.lt.s32.totalorder (!%p123_p2), %s678_s10, 1 }
   0x6   : > { %126 = sbr.rel (%p123_p2) target bundleno = 233 (0xe9), region = 28 }
   0xb   : > { %v165_v0 = vlaneseq  ;;  %s933_s10 = smov (!%p149_p3, %s678_s10), 1  ;;  %vm256_vm0 = vcmask 130048   ;;  %vm309_vm1 = vcmask 1040384  }
   0xc   : > { %s717_s11 = sshll.u32 %s933_s10, 4  ;;  %s716_s15 = sshll.u32 %s933_s10, 6 }
   0xd   : > { %v759_v1 = vand.u32 127, %v165_v0  ;;  %s158_s14 = scalar_lea.vmem %s928_s1, %s717_s11  ;;  %v189_v16 = vshrl.u32 %v165_v0, 7  ;;  %s797_s18 = scalar_lea.vmem %s927_s0, %s716_s15  ;;  %vm899_vm2 = vcmp.lt.s32.totalorder %v165_v0, 256 }
   0xe   : > { %v784_v12 = vld [vmem:[%s158_s14] sm:$0xff]  ;;  %v788_v15 = vld [vmem:[%s158_s14 + $0x8] sm:$0xff]  ;;  %v699_v32 = vld [vmem:[%s797_s18 + $0x10] sm:$0xff]  ;;  %s718_s19 = sshll.u32 %s933_s10, 3 }
   0xf   : > { %v168_v2 = vcvt.s32.f32 %v759_v1  ;;  %v765_v3 = vadd.s32 128, %v759_v1  ;;  %v190_v21 = vadd.s32 8, %v189_v16  ;;  %v251_v26 = vld [vmem:[%s797_s18] sm:$0xff]  ;;  %v800_v27 = vcvt.s32.f32 %v189_v16  ;;  %v252_v31 = vld [vmem:[%s797_s18 + $0x8] sm:$0xff]  ;;  %v700_v33 = vld [vmem:[%s797_s18 + $0x18] sm:$0xff]  ;;  %s906_s22 = scalar_lea.vmem %s929_s2, %s718_s19 }
  0x10   : > { %v814_v38 = vpack.c.bf16 %v252_v31, %v251_v26  ;;  %v816_v39 = vpack.c.bf16 %v700_v33, %v699_v32  ;;  %v709_v1 = vld [vmem:[%s797_s18 + $0x30] sm:$0xff] }
  0x11   : > { %v170_v4 = vadd.f32 0.5, %v168_v2  ;;  %v169_v5 = vcvt.s32.f32 %v765_v3  ;;  %v802_v28 = vcvt.s32.f32 %v190_v21 }
  0x13   : > { %v771_v6 = vmul.f32 0.0625, %v170_v4  ;;  %v171_v7 = vadd.f32 0.5, %v169_v5 }
  0x15   : > { %v174_v8 = vfloor.f32 %v771_v6  ;;  %v779_v9 = vmul.f32 0.0625, %v171_v7 }
  0x17   : > { %v180_v10 = vmul.f32 0.13333334, %v174_v8  ;;  %v175_v11 = vfloor.f32 %v779_v9 }
  0x19   : > { %v689_v13 = vadd.f32 -1.0, %v180_v10  ;;  %v181_v14 = vmul.f32 0.13333334, %v175_v11 }
  0x1b   : > { %v195_v17 = vadd.f32 %v689_v13, %v784_v12  ;;  %v690_v18 = vadd.f32 -1.0, %v181_v14 }
  0x1d   : > { %v199_v19 = vadd.f32 1.0, %v195_v17  ;;  %v196_v20 = vadd.f32 %v690_v18, %v788_v15 }
  0x1f   : > { %v201_v22 = vmul.f32 16.0, %v199_v19  ;;  %v200_v23 = vadd.f32 1.0, %v196_v20 }
  0x21   : > { %v693_v24 = vadd.f32 -1.0, %v201_v22  ;;  %v202_v25 = vmul.f32 16.0, %v200_v23 }
  0x23   : > { %v804_v29 = vmul.f32 0.5, %v693_v24  ;;  %v694_v30 = vadd.f32 -1.0, %v202_v25 }
  0x25   : > { %v215_v34 = vperm.slane %v804_v29, 4  ;;  %v317_v35 = vperm.slane %v804_v29, 5  ;;  %v811_v36 = vmul.f32 0.5, %v694_v30  ;;  %v513_v37 = vperm.slane %v804_v29, 7 }
  0x26   : > { %v415_v40 = vperm.slane %v804_v29, 6 }
  0x27   : > { %v217_v41 = vsub.f32 %v215_v34, %v800_v27  ;;  %v219_v42 = vsub.f32 %v215_v34, %v802_v28  ;;  %v319_v43 = vsub.f32 %v317_v35, %v800_v27  ;;  %v321_v44 = vsub.f32 %v317_v35, %v802_v28 }
  0x28   : > { %v216_v45 = vperm.slane %v811_v36, 4  ;;  %v318_v46 = vperm.slane %v811_v36, 5  ;;  %v514_v47 = vperm.slane %v811_v36, 7  ;;  %v515_v48 = vsub.f32 %v513_v37, %v800_v27 }
  0x29   : > { %v221_v49 = vand.u32 2147483647, %v217_v41  ;;  %v223_v50 = vand.u32 2147483647, %v219_v42  ;;  %v323_v51 = vand.u32 2147483647, %v319_v43  ;;  %v517_v52 = vsub.f32 %v513_v37, %v802_v28 }
  0x2a   : > { %v325_v53 = vand.u32 2147483647, %v321_v44  ;;  %v218_v54 = vsub.f32 %v216_v45, %v800_v27  ;;  %v220_v55 = vsub.f32 %v216_v45, %v802_v28  ;;  %v320_v56 = vsub.f32 %v318_v46, %v800_v27 }
  0x2b   : > { %v225_v57 = vsub.f32 1.0, %v221_v49  ;;  %v227_v58 = vsub.f32 1.0, %v223_v50  ;;  %v327_v59 = vsub.f32 1.0, %v323_v51  ;;  %v322_v60 = vsub.f32 %v318_v46, %v802_v28 }
  0x2c   : > { %v329_v61 = vsub.f32 1.0, %v325_v53  ;;  %v222_v62 = vand.u32 2147483647, %v218_v54  ;;  %v224_v63 = vand.u32 2147483647, %v220_v55  ;;  %v516_v4 = vsub.f32 %v514_v47, %v800_v27 }
  0x2d   : > { %v229_v7 = vmax.f32 %v225_v57, 0.0  ;;  %v231_v10 = vmax.f32 %v227_v58, 0.0  ;;  %v331_v13 = vmax.f32 %v327_v59, 0.0  ;;  %v324_v14 = vand.u32 2147483647, %v320_v56 }
  0x2e   : > { %v333_v16 = vmax.f32 %v329_v61, 0.0  ;;  %v226_v17 = vsub.f32 1.0, %v222_v62  ;;  %v228_v18 = vsub.f32 1.0, %v224_v63  ;;  %v326_v19 = vand.u32 2147483647, %v322_v60 }
  0x2f   : > { %v254_v20 = vpack.c.bf16 %v231_v10, %v229_v7  ;;  %v328_v21 = vsub.f32 1.0, %v324_v14  ;;  %v518_v22 = vsub.f32 %v514_v47, %v802_v28  ;;  %v520_v23 = vand.u32 2147483647, %v516_v4 }
  0x30   : > { %v357_v24 = vpack.c.bf16 %v333_v16, %v331_v13  ;;  %v230_v25 = vmax.f32 %v226_v17, 0.0  ;;  %v232_v26 = vmax.f32 %v228_v18, 0.0  ;;  %v330_v30 = vsub.f32 1.0, %v326_v19  ;;  %v704_v16 = vld [vmem:[%s797_s18 + $0x20] sm:$0xff]  ;;  %v705_v17 = vld [vmem:[%s797_s18 + $0x28] sm:$0xff] }
  0x31   : > { %267 = vmatpush.bf16.msra.mxu0 %v254_v20  ;;  %v332_v31 = vmax.f32 %v328_v21, 0.0  ;;  %v522_v32 = vand.u32 2147483647, %v518_v22  ;;  %v524_v33 = vsub.f32 1.0, %v520_v23  ;;  %v519_v34 = vand.u32 2147483647, %v515_v48 }
  0x32   : > { %369 = vmatpush.bf16.msra.mxu2 %v357_v24  ;;  %v255_v35 = vpack.c.bf16 %v232_v26, %v230_v25  ;;  %v334_v37 = vmax.f32 %v330_v30, 0.0  ;;  %v521_v41 = vand.u32 2147483647, %v517_v52  ;;  %v416_v42 = vperm.slane %v811_v36, 6 }
  0x33   : > { %v526_v43 = vsub.f32 1.0, %v522_v32  ;;  %v528_v44 = vmax.f32 %v524_v33, 0.0  ;;  %v523_v45 = vsub.f32 1.0, %v519_v34  ;;  %v417_v46 = vsub.f32 %v415_v40, %v800_v27 }
  0x34   : > { %281 = vmatpush.bf16.msra.mxu1 %v255_v35  ;;  %v358_v47 = vpack.c.bf16 %v334_v37, %v332_v31  ;;  %697 = vmatmul.msk.bf16.vlgmr.msra.gmra.mxu0 %vm256_vm0, %v814_v38  ;;  %v525_v49 = vsub.f32 1.0, %v521_v41  ;;  %v418_v48 = vsub.f32 %v416_v42, %v800_v27  ;;  %v420_v50 = vsub.f32 %v416_v42, %v802_v28 }
  0x35   : > { %701 = vmatmul.msk.bf16.vlgmr.msra.gmra.mxu2 %vm256_vm0, %v816_v39  ;;  %v530_v36 = vmax.f32 %v526_v43, 0.0  ;;  %v527_v51 = vmax.f32 %v523_v45, 0.0  ;;  %v419_v52 = vsub.f32 %v415_v40, %v802_v28  ;;  %v421_v53 = vand.u32 2147483647, %v417_v46 }
  0x36   : > { %383 = vmatpush.bf16.msra.mxu3 %v358_v47  ;;  %v529_v54 = vmax.f32 %v525_v49, 0.0  ;;  %v422_v55 = vand.u32 2147483647, %v418_v48  ;;  %v424_v56 = vand.u32 2147483647, %v420_v50  ;;  %v176_v57 = vmul.f32 16.0, %v174_v8 }
  0x37   : > { %698 = vmatmul.msk.bf16.vlgmr.msra.gmra.mxu1 %vm256_vm0, %v814_v38  ;;  %v554_v58 = vpack.c.bf16 %v530_v36, %v528_v44  ;;  %v423_v59 = vand.u32 2147483647, %v419_v52  ;;  %v425_v60 = vsub.f32 1.0, %v421_v53  ;;  %v177_v20 = vmul.f32 16.0, %v175_v11 }
  0x38   : > { %v553_v61 = vpack.c.bf16 %v529_v54, %v527_v51  ;;  %v426_v62 = vsub.f32 1.0, %v422_v55  ;;  %v428_v29 = vsub.f32 1.0, %v424_v56  ;;  %v178_v40 = vsub.f32 %v168_v2, %v176_v57  ;;  %v710_v2 = vld [vmem:[%s797_s18 + $0x38] sm:$0xff] }
  0x39   : > { %702 = vmatmul.msk.bf16.vlgmr.msra.gmra.mxu3 %vm256_vm0, %v816_v39  ;;  %v427_v6 = vsub.f32 1.0, %v423_v59  ;;  %v429_v8 = vmax.f32 %v425_v60, 0.0  ;;  %v454_v39 = vpack.c.bf16 %v705_v17, %v704_v16  ;;  %v552_v19 = vpack.c.bf16 %v710_v2, %v709_v1 }
  0x3a   : > { %579 = vmatpush.bf16.msrb.mxu3 %v554_v58  ;;  %565 = vmatpush.bf16.msrb.mxu2 %v553_v61  ;;  %v430_v38 = vmax.f32 %v426_v62, 0.0  ;;  %v432_v63 = vmax.f32 %v428_v29, 0.0  ;;  %v184_v4 = vmul.f32 0.13333334, %v178_v40  ;;  %v179_v21 = vsub.f32 %v169_v5, %v177_v20 }
  0x3b   : > { %v431_v7 = vmax.f32 %v427_v6, 0.0 }
  0x3c   : > { %v456_v10 = vpack.c.bf16 %v432_v63, %v430_v38  ;;  %v691_v13 = vadd.f32 -1.0, %v184_v4  ;;  %v185_v22 = vmul.f32 0.13333334, %v179_v21 }
  0x3d   : > { %v455_v14 = vpack.c.bf16 %v431_v7, %v429_v8 }
  0x3e   : > { %481 = vmatpush.bf16.msrb.mxu1 %v456_v10  ;;  %v197_v18 = vadd.f32 %v691_v13, %v784_v12  ;;  %v692_v23 = vadd.f32 -1.0, %v185_v22 }
  0x3f   : > { %467 = vmatpush.bf16.msrb.mxu0 %v455_v14 }
  0x40   : > { %v207_v12 = vadd.f32 1.0, %v197_v18  ;;  %v198_v24 = vadd.f32 %v692_v23, %v788_v15 }
  0x42   : > { %v209_v25 = vmul.f32 16.0, %v207_v12  ;;  %v208_v26 = vadd.f32 1.0, %v198_v24 }
  0x44   : > { %706 = vmatmul.msk.bf16.vlgmr.msrb.gmra.mxu0 %vm256_vm0, %v454_v39  ;;  %v695_v30 = vadd.f32 -1.0, %v209_v25  ;;  %v210_v31 = vmul.f32 16.0, %v208_v26 }
  0x45   : > { %711 = vmatmul.msk.bf16.vlgmr.msrb.gmra.mxu2 %vm256_vm0, %v552_v19 }
  0x46   : > { %v869_v32 = vmul.f32 0.5, %v695_v30  ;;  %v696_v33 = vadd.f32 -1.0, %v210_v31 }
  0x47   : > { %707 = vmatmul.msk.bf16.vlgmr.msrb.gmra.mxu1 %vm256_vm0, %v454_v39 }
  0x48   : > { %v233_v34 = vperm.slane %v869_v32, 0  ;;  %v872_v35 = vmul.f32 0.5, %v696_v33  ;;  %v335_v15 = vperm.slane %v869_v32, 1  ;;  %v433_v55 = vperm.slane %v869_v32, 2 }
  0x49   : > { %712 = vmatmul.msk.bf16.vlgmr.msrb.gmra.mxu3 %vm256_vm0, %v552_v19  ;;  %v531_v16 = vperm.slane %v869_v32, 3 }
  0x4a   : > { %v235_v9 = vsub.f32 %v233_v34, %v800_v27  ;;  %v234_v3 = vperm.slane %v872_v35, 0  ;;  %v237_v5 = vsub.f32 %v233_v34, %v802_v28  ;;  %v336_v43 = vperm.slane %v872_v35, 1 }
  0x4b   : > { %v337_v45 = vsub.f32 %v335_v15, %v800_v27  ;;  %v339_v48 = vsub.f32 %v335_v15, %v802_v28  ;;  %v435_v6 = vsub.f32 %v433_v55, %v800_v27  ;;  %v434_v10 = vperm.slane %v872_v35, 2 }
  0x4c   : > { %v239_v11 = vand.u32 2147483647, %v235_v9  ;;  %v236_v37 = vsub.f32 %v234_v3, %v800_v27  ;;  %v238_v41 = vsub.f32 %v234_v3, %v802_v28  ;;  %v241_v42 = vand.u32 2147483647, %v237_v5 }
  0x4d   : > { %v338_v36 = vsub.f32 %v336_v43, %v800_v27  ;;  %v341_v53 = vand.u32 2147483647, %v337_v45  ;;  %v340_v54 = vsub.f32 %v336_v43, %v802_v28  ;;  %v343_v58 = vand.u32 2147483647, %v339_v48 }
  0x4e   : > { %v243_v44 = vsub.f32 1.0, %v239_v11  ;;  %v240_v47 = vand.u32 2147483647, %v236_v37  ;;  %v242_v49 = vand.u32 2147483647, %v238_v41  ;;  %v245_v50 = vsub.f32 1.0, %v241_v42 }
  0x4f   : > { %v342_v60 = vand.u32 2147483647, %v338_v36  ;;  %v345_v62 = vsub.f32 1.0, %v341_v53  ;;  %v344_v40 = vand.u32 2147483647, %v340_v54  ;;  %v347_v4 = vsub.f32 1.0, %v343_v58 }
  0x50   : > { %v247_v51 = vmax.f32 %v243_v44, 0.0  ;;  %v244_v56 = vsub.f32 1.0, %v240_v47  ;;  %v246_v57 = vsub.f32 1.0, %v242_v49  ;;  %v249_v59 = vmax.f32 %v245_v50, 0.0 }
  0x51   : > { %v437_v13 = vsub.f32 %v433_v55, %v802_v28  ;;  %v346_v14 = vsub.f32 1.0, %v342_v60  ;;  %v349_v17 = vmax.f32 %v345_v62, 0.0  ;;  %v348_v39 = vsub.f32 1.0, %v344_v40 }
  0x52   : > { %v248_v8 = vmax.f32 %v244_v56, 0.0  ;;  %v250_v63 = vmax.f32 %v246_v57, 0.0  ;;  %v439_v19 = vand.u32 2147483647, %v435_v6  ;;  %v351_v22 = vmax.f32 %v347_v4, 0.0 }
  0x53   : > { %v532_v23 = vperm.slane %v872_v35, 3  ;;  %v436_v24 = vsub.f32 %v434_v10, %v800_v27  ;;  %v441_v25 = vand.u32 2147483647, %v437_v13  ;;  %v438_v26 = vsub.f32 %v434_v10, %v802_v28 }
  0x54   : > { %v350_v30 = vmax.f32 %v346_v14, 0.0  ;;  %v533_v32 = vsub.f32 %v531_v16, %v800_v27  ;;  %v352_v9 = vmax.f32 %v348_v39, 0.0  ;;  %v443_v3 = vsub.f32 1.0, %v439_v19 }
  0x55   : > { %v535_v5 = vsub.f32 %v531_v16, %v802_v28  ;;  %v534_v41 = vsub.f32 %v532_v23, %v800_v27  ;;  %v440_v43 = vand.u32 2147483647, %v436_v24  ;;  %v445_v44 = vsub.f32 1.0, %v441_v25 }
  0x56   : > { %v442_v45 = vand.u32 2147483647, %v438_v26  ;;  %v537_v49 = vand.u32 2147483647, %v533_v32  ;;  %v447_v36 = vmax.f32 %v443_v3, 0.0  ;;  %v536_v53 = vsub.f32 %v532_v23, %v802_v28 }
  0x57   : > { %v444_v58 = vsub.f32 1.0, %v440_v43  ;;  %v449_v27 = vmax.f32 %v445_v44, 0.0 }
  0x58   : > { %v446_v60 = vsub.f32 1.0, %v442_v45  ;;  %v541_v40 = vsub.f32 1.0, %v537_v49 }
  0x59   : > { %v448_v14 = vmax.f32 %v444_v58, 0.0 }
  0x5a   : > { %v545_v39 = vmax.f32 %v541_v40, 0.0 }
  0xb1   : > { %v269_v46 = vpop.f32.mrf.mxu0 }
  0xb2   : > { %v288_v61 = vmul.f32 %v269_v46, %v247_v51 }
  0xb4   : > { %v283_v52 = vpop.f32.mrf.mxu1 }
  0xb5   : > { %v289_v20 = vmul.f32 %v283_v52, %v248_v8  ;;  %v539_v52 = vand.u32 2147483647, %v535_v5 }
  0xb8   : > { %v371_v29 = vpop.f32.mrf.mxu2 }
  0xb9   : > { %v271_v38 = vpop.f32.mrf.mxu0  ;;  %v390_v11 = vmul.f32 %v371_v29, %v349_v17 }
  0xba   : > { %v290_v7 = vmul.f32 %v271_v38, %v249_v59  ;;  %v538_v59 = vand.u32 2147483647, %v534_v41  ;;  %v543_v38 = vsub.f32 1.0, %v539_v52 }
  0xbc   : > { %v292_v1 = vadd.f32 %v290_v7, %v288_v61  ;;  %v385_v2 = vpop.f32.mrf.mxu3  ;;  %v285_v18 = vpop.f32.mrf.mxu1  ;;  %v542_v17 = vsub.f32 1.0, %v538_v59  ;;  %v547_v23 = vmax.f32 %v543_v38, 0.0 }
  0xbd   : > { %v291_v21 = vmul.f32 %v285_v18, %v250_v63  ;;  %v391_v48 = vmul.f32 %v385_v2, %v350_v30  ;;  %v540_v63 = vand.u32 2147483647, %v536_v53 }
  0xbe   : > { %v293_v12 = vrot.slane %v292_v1, 4  ;;  %v546_v3 = vmax.f32 %v542_v17, 0.0 }
  0xbf   : > { %v299_v31 = vadd.f32 %v291_v21, %v289_v20 }
  0xc0   : > { %v294_v33 = vadd.f32 %v293_v12, %v292_v1  ;;  %v373_v34 = vpop.f32.mrf.mxu2  ;;  %v450_v1 = vmax.f32 %v446_v60, 0.0  ;;  %v544_v12 = vsub.f32 1.0, %v540_v63 }
  0xc1   : > { %v300_v15 = vrot.slane %v299_v31, 4  ;;  %v392_v37 = vmul.f32 %v373_v34, %v351_v22  ;;  %v469_v35 = vpop.f32.mrf.mxu0 }
  0xc2   : > { %v295_v42 = vrot.slane %v294_v33, 2  ;;  %v488_v6 = vmul.f32 %v469_v35, %v447_v36 }
  0xc3   : > { %v301_v46 = vadd.f32 %v300_v15, %v299_v31  ;;  %v394_v47 = vadd.f32 %v392_v37, %v390_v11  ;;  %v548_v15 = vmax.f32 %v544_v12, 0.0 }
  0xc4   : > { %v387_v50 = vpop.f32.mrf.mxu3  ;;  %v483_v51 = vpop.f32.mrf.mxu1  ;;  %v296_v54 = vadd.f32 %v295_v42, %v294_v33 }
  0xc5   : > { %v302_v55 = vrot.slane %v301_v46, 2  ;;  %v395_v56 = vrot.slane %v394_v47, 4  ;;  %v393_v57 = vmul.f32 %v387_v50, %v352_v9  ;;  %v489_v31 = vmul.f32 %v483_v51, %v448_v14 }
  0xc6   : > { %v297_v4 = vrot.slane %v296_v54, 1 }
  0xc7   : > { %v303_v61 = vadd.f32 %v302_v55, %v301_v46  ;;  %v396_v62 = vadd.f32 %v395_v56, %v394_v47  ;;  %v401_v29 = vadd.f32 %v393_v57, %v391_v48 }
  0xc8   : > { %v567_v8 = vpop.f32.mrf.mxu2  ;;  %v298_v24 = vadd.f32 %v297_v4, %v296_v54 }
  0xc9   : > { %v304_v7 = vrot.slane %v303_v61, 1  ;;  %v397_v28 = vrot.slane %v396_v62, 2  ;;  %v402_v10 = vrot.slane %v401_v29, 4  ;;  %v471_v13 = vpop.f32.mrf.mxu0  ;;  %v586_v41 = vmul.f32 %v567_v8, %v545_v39 }
  0xca   : > { %v490_v16 = vmul.f32 %v471_v13, %v449_v27 }
  0xcb   : > { %v305_v2 = vadd.f32 %v304_v7, %v303_v61  ;;  %v403_v18 = vadd.f32 %v402_v10, %v401_v29  ;;  %v398_v26 = vadd.f32 %v397_v28, %v396_v62 }
  0xcc   : > { %v492_v20 = vadd.f32 %v490_v16, %v488_v6  ;;  %v581_v21 = vpop.f32.mrf.mxu3  ;;  %v485_v22 = vpop.f32.mrf.mxu1 }
  0xcd   : > { %v308_v25 = vrot.slane %v305_v2, 7  ;;  %v404_v30 = vrot.slane %v403_v18, 2  ;;  %v491_v32 = vmul.f32 %v485_v22, %v450_v1  ;;  %v399_v37 = vrot.slane %v398_v26, 1 }
  0xce   : > { %v493_v0 = vrot.slane %v492_v20, 4  ;;  %v587_v47 = vmul.f32 %v581_v21, %v546_v3 }
  0xcf   : > { %v310_v33 = vsel %vm309_vm1, %v298_v24, %v308_v25  ;;  %v405_v34 = vadd.f32 %v404_v30, %v403_v18  ;;  %v499_v5 = vadd.f32 %v491_v32, %v489_v31  ;;  %v400_v50 = vadd.f32 %v399_v37, %v398_v26 }
  0xd0   : > { %316 = vst.msk [vmem:[%s906_s22] ss:$4 sm:$0x3] %vm899_vm2, %v310_v33  ;;  %v494_v9 = vadd.f32 %v493_v0, %v492_v20  ;;  %v569_v11 = vpop.f32.mrf.mxu2 }
  0xd1   : > { %v406_v35 = vrot.slane %v405_v34, 1  ;;  %v588_v42 = vmul.f32 %v569_v11, %v547_v23  ;;  %v500_v44 = vrot.slane %v499_v5, 4 }
  0xd2   : > { %v495_v43 = vrot.slane %v494_v9, 2 }
  0xd3   : > { %v407_v45 = vadd.f32 %v406_v35, %v405_v34  ;;  %v590_v46 = vadd.f32 %v588_v42, %v586_v41  ;;  %v501_v49 = vadd.f32 %v500_v44, %v499_v5 }
  0xd4   : > { %v583_v48 = vpop.f32.mrf.mxu3  ;;  %v496_v53 = vadd.f32 %v495_v43, %v494_v9 }
  0xd5   : > { %v410_v36 = vrot.slane %v407_v45, 7  ;;  %v591_v51 = vrot.slane %v590_v46, 4  ;;  %v589_v52 = vmul.f32 %v583_v48, %v548_v15  ;;  %v502_v54 = vrot.slane %v501_v49, 2 }
  0xd6   : > { %v497_v60 = vrot.slane %v496_v53, 1 }
  0xd7   : > { %v411_v55 = vsel %vm309_vm1, %v400_v50, %v410_v36  ;;  %v592_v56 = vadd.f32 %v591_v51, %v590_v46  ;;  %v597_v57 = vadd.f32 %v589_v52, %v587_v47  ;;  %v503_v58 = vadd.f32 %v502_v54, %v501_v49 }
  0xd8   : > { %703 = vst.msk [vmem:[%s906_s22 + $0x1] ss:$4 sm:$0x3] %vm899_vm2, %v411_v55  ;;  %v498_v8 = vadd.f32 %v497_v60, %v496_v53 }
  0xd9   : > { %v593_v27 = vrot.slane %v592_v56, 2  ;;  %v598_v59 = vrot.slane %v597_v57, 4  ;;  %v504_v61 = vrot.slane %v503_v58, 1 }
  0xdb   : > { %v599_v62 = vadd.f32 %v598_v59, %v597_v57  ;;  %v505_v29 = vadd.f32 %v504_v61, %v503_v58  ;;  %v594_v40 = vadd.f32 %v593_v27, %v592_v56 }
  0xdd   : > { %v600_v6 = vrot.slane %v599_v62, 2  ;;  %v508_v38 = vrot.slane %v505_v29, 7  ;;  %v595_v7 = vrot.slane %v594_v40, 1 }
  0xdf   : > { %v601_v63 = vadd.f32 %v600_v6, %v599_v62  ;;  %v509_v4 = vsel %vm309_vm1, %v498_v8, %v508_v38  ;;  %v596_v13 = vadd.f32 %v595_v7, %v594_v40 }
  0xe0   : > { %708 = vst.msk [vmem:[%s906_s22 + $0x2] ss:$4 sm:$0x3] %vm899_vm2, %v509_v4 }
  0xe1   : > { %v602_v28 = vrot.slane %v601_v63, 1 }
  0xe3   : > { %v603_v10 = vadd.f32 %v602_v28, %v601_v63 }
  0xe5   : > { %v606_v14 = vrot.slane %v603_v10, 7 }
  0xe7   : > { %v607_v16 = vsel %vm309_vm1, %v596_v13, %v606_v14 }
  0xe8   : > { %713 = vst.msk [vmem:[%s906_s22 + $0x3] ss:$4 sm:$0x3] %vm899_vm2, %v607_v16 }
  0xe9 PF: > { %s12_s9 = sadd.s32 1, %s733_s9  }
  0xea   : > { %p9_p4 = scmp.ge.s32.totalorder %s12_s9, 4  }
  0xec   :  { %11 = sbr.rel (!%p9_p4) target bundleno = 1 (0x1), region = 67 }

// kernel: conv2d_deformable_forward.3
= control target key start
LH: loop header
LB: loop body
LE: loop exit
PB: predicated region body
PF: predicated region fallthrough
CT: control target
= control target key end

     0   :  { %s920_s12 = smov 0   ;;  %s1137_s0 = inlined_call_operand.vmem [shape: f32[2,4,256], index: 0, kind: input, shape index: {}]   ;;  %s1138_s1 = inlined_call_operand.vmem [shape: bf16[9,8,4], index: 1, kind: input, shape index: {}]   ;;  %s1139_s2 = inlined_call_operand.vmem [shape: f32[8,1], index: 2, kind: input, shape index: {}]   ;;  %s1140_s3 = inlined_call_operand.vmem [shape: f32[2,8,256], index: 3, kind: output, shape index: {}]  }
   0x1 LB: > { %s785_s13 = sadd.s32 4294967295, %s889_s12   ;;  %p789_p0 = scmp.ge.s32.totalorder %s889_s12, 1  ;;  %s889_s12 = sphi %s920_s12, %s13_s12  }
   0x2   : > { %p137_p1 = scmp.lt.s32.totalorder %s889_s12, 3 }
   0x4   : > { %p138_p2 = pnand %p789_p0, %p137_p1 }
   0x5   : > { %p161_p3 = scmp.lt.s32.totalorder (!%p138_p2), %s785_s13, 1  ;;  %s891_s18 = smov (!%p138_p2), 16  }
   0x6   : > { %141 = sbr.rel (%p138_p2) target bundleno = 356 (0x164), region = 32  ;;  %s892_s19 = smov (!%p138_p2), 17  }
   0x7   : > { %s893_s20 = smov (!%p138_p2), 15   ;;  %s894_s21 = smov (!%p138_p2), 1  }
   0x8   : > { %s895_s22 = smov (!%p138_p2), 127   ;;  %s896_s23 = smov (!%p138_p2), 113  }
   0x9   : > { %s897_s24 = smov (!%p138_p2), 112   ;;  %s898_s25 = smov (!%p138_p2), 111  }
   0xb   : > { %s1150_s13 = smov (!%p161_p3, %s785_s13), 1  ;;  %v173_v27 = vlaneseq  ;;  %vm242_vm3 = vcmask 1041408   ;;  %v794_v58 = vld [vmem:[%s1138_s1 + $0x4] sm:$0xf]  ;;  %vm238_vm9 = vcmask 31744  }
   0xc   : > { %s822_s14 = sshll.u32 %s1150_s13, 3 }
   0xd   : > { %s165_s17 = scalar_lea.vmem %s1137_s0, %s822_s14  ;;  %v938_v28 = vand.u32 127, %v173_v27 }
   0xe   : > { %v172_v0 = vld [vmem:[%s165_s17] sm:$0xff] }
   0xf   : > { %189 = vst [vmem:[#allocation1] ss:$2 sm:$0xff] %v172_v0  ;;  %v175_v29 = vadd.s32 128, %v938_v28  ;;  %v176_v30 = vcvt.s32.f32 %v938_v28  ;;  %vm225_vm1 = vcmp.lt.s32.totalorder %v938_v28, 16  ;;  %vm198_vm10 = vcmp.lt.s32.totalorder %v938_v28, 17 }
  0x10   : > { %vm319_vm12 = vcmp.lt.s32.totalorder %v938_v28, 15  ;;  %vm487_vm13 = vcmp.lt.s32.totalorder %v938_v28, 127 }
  0x11   : > { %v177_v31 = vcvt.s32.f32 %v175_v29  ;;  %v178_v32 = vadd.f32 0.5, %v176_v30 }
  0x13   : > { %v179_v33 = vadd.f32 0.5, %v177_v31  ;;  %v180_v34 = vmul.f32 0.0625, %v178_v32 }
  0x15   : > { %v181_v35 = vmul.f32 0.0625, %v179_v33  ;;  %v942_v36 = vfloor.f32 %v180_v34 }
  0x16   : > { %v190_v1 = vld.sshfl [vmem:[#allocation1] sm:$0xff pattern:$0x75316420]  ;;  %v191_v2 = vld.sshfl [vmem:[#allocation1 + $0x8] sm:$0xff pattern:$0x75316420] }
  0x17   : > { %216 = vst [vmem:[#allocation1] ss:$2 sm:$0xff] %v172_v0  ;;  %v846_v6 = vpack.i.bf16 %v191_v2, %v190_v1  ;;  %v944_v37 = vfloor.f32 %v181_v35  ;;  %v184_v38 = vmul.f32 16.0, %v942_v36  ;;  %vm201_vm0 = vcmp.ge.f32.partialorder %v942_v36, 1.0  ;;  %v808_v1 = vld [vmem:[%s1138_s1 + $0x14] sm:$0xf] }
  0x19   : > { %v185_v39 = vmul.f32 16.0, %v944_v37  ;;  %v950_v41 = vsub.f32 %v176_v30, %v184_v38  ;;  %vm202_vm2 = vcmp.ge.f32.partialorder %v944_v37, 1.0 }
  0x1b   : > { %v953_v44 = vsub.f32 %v177_v31, %v185_v39  ;;  %vm203_vm4 = vcmp.ge.f32.partialorder %v950_v41, 1.0  ;;  %vm322_vm6 = vcmp.le.f32.partialorder %v950_v41, 14.0 }
  0x1c   : > { %vm972_vm7 = vmand %vm201_vm0, %vm203_vm4 }
  0x1d   : > { %vm204_vm5 = vcmp.ge.f32.partialorder %v953_v44, 1.0  ;;  %vm323_vm8 = vcmp.le.f32.partialorder %v953_v44, 14.0  ;;  %vm324_vm14 = vmand %vm201_vm0, %vm322_vm6  ;;  %v817_v44 = vld [vmem:[%s1138_s1 + $0x20] sm:$0xf] }
  0x1e   : > { %v217_v3 = vld.sshfl [vmem:[#allocation1] sm:$0xff pattern:$0x75316420]  ;;  %v218_v4 = vld.sshfl [vmem:[#allocation1 + $0x8] sm:$0xff pattern:$0x75316420]  ;;  %vm985_vm11 = vmand %vm202_vm2, %vm204_vm5 }
  0x1f   : > { %v841_v5 = vpack.i.bf16 %v218_v4, %v217_v3  ;;  %310 = vst [vmem:[#allocation1] ss:$2 sm:$0xff] %v172_v0  ;;  %vm999_vm15 = vmand %vm202_vm2, %vm323_vm8 }
  0x21   : > { %842 = vrot.lane.b32.xlu0 %v841_v5, %s891_s18 }
  0x26   : > { %v311_v7 = vld.sshfl [vmem:[#allocation1] sm:$0xff pattern:$0x75316420]  ;;  %v312_v8 = vld.sshfl [vmem:[#allocation1 + $0x8] sm:$0xff pattern:$0x75316420] }
  0x27   : > { %v851_v9 = vpack.i.bf16 %v312_v8, %v311_v7  ;;  %373 = vst [vmem:[#allocation1] ss:$2 sm:$0xff] %v172_v0 }
  0x29   : > { %847 = vrot.lane.b32.xlu0 %v846_v6, %s892_s19  ;;  %852 = vrot.lane.b32.xlu1 %v851_v9, %s893_s20 }
  0x2e   : > { %v374_v10 = vld.sshfl [vmem:[#allocation1] sm:$0xff pattern:$0x75316420]  ;;  %v375_v11 = vld.sshfl [vmem:[#allocation1 + $0x8] sm:$0xff pattern:$0x75316420] }
  0x2f   : > { %v856_v12 = vpack.i.bf16 %v375_v11, %v374_v10  ;;  %434 = vst [vmem:[#allocation1] ss:$2 sm:$0xff] %v172_v0 }
  0x31   : > { %857 = vrot.lane.b32.xlu1 %v856_v12, %s894_s21  ;;  %s823_s21 = sshll.u32 %s1150_s13, 4 }
  0x36   : > { %v934_v13 = vld.sshfl [vmem:[#allocation1] sm:$0xff pattern:$0x75316420]  ;;  %v936_v14 = vld.sshfl [vmem:[#allocation1 + $0x8] sm:$0xff pattern:$0x75316420] }
  0x37   : > { %478 = vst [vmem:[#allocation1] ss:$2 sm:$0xff] %v172_v0  ;;  %v440_v51 = vpack.c.bf16 %v936_v14, %v936_v14  ;;  %v439_v52 = vpack.c.bf16 %v934_v13, %v934_v13 }
  0x39   : > { %v448_v2 = vsel %vm242_vm3, %v440_v51, 0  ;;  %v445_v5 = vsel %vm242_vm3, %v439_v52, 0 }
  0x3e   : > { %v479_v15 = vld.sshfl [vmem:[#allocation1] sm:$0xff pattern:$0x75316420]  ;;  %v480_v16 = vld.sshfl [vmem:[#allocation1 + $0x8] sm:$0xff pattern:$0x75316420] }
  0x3f   : > { %537 = vst [vmem:[#allocation1] ss:$2 sm:$0xff] %v172_v0  ;;  %v861_v17 = vpack.i.bf16 %v480_v16, %v479_v15 }
  0x41   : > { %862 = vrot.lane.b32.xlu2 %v861_v17, %s895_s22 }
  0x46   : > { %v538_v18 = vld.sshfl [vmem:[#allocation1] sm:$0xff pattern:$0x75316420]  ;;  %v539_v19 = vld.sshfl [vmem:[#allocation1 + $0x8] sm:$0xff pattern:$0x75316420] }
  0x47   : > { %600 = vst [vmem:[#allocation1] ss:$2 sm:$0xff] %v172_v0  ;;  %v866_v20 = vpack.i.bf16 %v539_v19, %v538_v18 }
  0x49   : > { %867 = vrot.lane.b32.xlu2 %v866_v20, %s896_s23 }
  0x4e   : > { %v601_v21 = vld.sshfl [vmem:[#allocation1] sm:$0xff pattern:$0x75316420]  ;;  %v602_v22 = vld.sshfl [vmem:[#allocation1 + $0x8] sm:$0xff pattern:$0x75316420] }
  0x4f   : > { %v871_v23 = vpack.i.bf16 %v602_v22, %v601_v21  ;;  %659 = vst [vmem:[#allocation1] ss:$2 sm:$0xff] %v172_v0 }
  0x51   : > { %872 = vrot.lane.b32.xlu0 %v871_v23, %s897_s24  ;;  %s170_s24 = scalar_lea.vmem %s1140_s3, %s823_s21 }
  0x56   : > { %v660_v24 = vld.sshfl [vmem:[#allocation1] sm:$0xff pattern:$0x75316420]  ;;  %v661_v25 = vld.sshfl [vmem:[#allocation1 + $0x8] sm:$0xff pattern:$0x75316420] }
  0x57   : > { %v876_v26 = vpack.i.bf16 %v661_v25, %v660_v24 }
  0x59   : > { %877 = vrot.lane.b32.xlu1 %v876_v26, %s898_s25  ;;  %v213_v26 = vld [vmem:[%s1138_s1] sm:$0xf] }
  0x93   : > { %v843_v40 = vpop.permute.xlu0 %842 }
  0x94   : > { %v845_v42 = vunpack.i.h.bf16 %v843_v40  ;;  %v844_v43 = vunpack.i.l.bf16 %v843_v40 }
  0x96   : > { %v227_v45 = vsel %vm225_vm1, %v845_v42, %v844_v43  ;;  %v226_v46 = vsel %vm225_vm1, %v844_v43, %v845_v42  ;;  %vm550_vm1 = vcmp.le.f32.partialorder %v944_v37, 14.0  ;;  %v814_v37 = vld [vmem:[%s1138_s1 + $0x1c] sm:$0xf] }
  0x97   : > { %v232_v47 = vsel %vm201_vm0, %v227_v45, 0.0  ;;  %v233_v48 = vsel %vm202_vm2, %v226_v46, 0.0  ;;  %vm549_vm0 = vcmp.le.f32.partialorder %v942_v36, 14.0  ;;  %vm382_vm2 = vcmp.lt.s32.totalorder %v938_v28, 1 }
  0x98   : > { %v236_v49 = vpack.c.bf16 %v232_v47, %v232_v47  ;;  %v237_v50 = vpack.c.bf16 %v233_v48, %v233_v48 }
  0x9a   : > { %v244_v53 = vsel %vm242_vm3, %v236_v49, 0  ;;  %v247_v54 = vsel %vm242_vm3, %v237_v50, 0 }
  0x9b   : > { %v848_v56 = vpop.permute.xlu0 %847  ;;  %256 = vmatpush.bf16.msra.mxu0 %v244_v53  ;;  %269 = vmatpush.bf16.msra.mxu1 %v247_v54  ;;  %v853_v57 = vpop.permute.xlu1 %852 }
  0x9c   : > { %v850_v60 = vunpack.i.h.bf16 %v848_v56  ;;  %v849_v61 = vunpack.i.l.bf16 %v848_v56  ;;  %v855_v62 = vunpack.i.h.bf16 %v853_v57  ;;  %v854_v63 = vunpack.i.l.bf16 %v853_v57  ;;  %v863_v0 = vpop.permute.xlu2 %862  ;;  %v799_v57 = vld [vmem:[%s1138_s1 + $0x8] sm:$0xf] }
  0x9d   : > { %v865_v3 = vunpack.i.h.bf16 %v863_v0  ;;  %v864_v4 = vunpack.i.l.bf16 %v863_v0 }
  0x9e   : > { %795 = vmatmul.msk.bf16.vlgmr.msra.gmra.mxu0 %vm238_vm9, %v794_v58  ;;  %796 = vmatmul.msk.bf16.vlgmr.msra.gmra.mxu1 %vm238_vm9, %v794_v58  ;;  %v200_v6 = vsel %vm198_vm10, %v850_v60, %v849_v61  ;;  %v199_v7 = vsel %vm198_vm10, %v849_v61, %v850_v60  ;;  %v321_v8 = vsel %vm319_vm12, %v855_v62, %v854_v63  ;;  %vm1044_vm10 = vmand %vm549_vm0, %vm203_vm4  ;;  %v802_v60 = vld [vmem:[%s1138_s1 + $0xc] sm:$0xf]  ;;  %v805_v61 = vld [vmem:[%s1138_s1 + $0x10] sm:$0xf] }
  0x9f   : > { %v211_v9 = vsel %vm972_vm7, %v200_v6, 0.0  ;;  %v212_v10 = vsel %vm985_vm11, %v199_v7, 0.0  ;;  %v330_v11 = vsel %vm324_vm14, %v321_v8, 0.0  ;;  %v320_v12 = vsel %vm319_vm12, %v854_v63, %v855_v62  ;;  %vm552_vm11 = vmand %vm550_vm1, %vm204_vm5  ;;  %v720_v62 = vld [vmem:[%s1139_s2] sm:$0xff] }
  0xa0   : > { %v214_v13 = vpack.c.bf16 %v211_v9, %v211_v9  ;;  %v215_v14 = vpack.c.bf16 %v212_v10, %v212_v10  ;;  %v334_v15 = vpack.c.bf16 %v330_v11, %v330_v11  ;;  %v331_v16 = vsel %vm999_vm15, %v320_v12, 0.0  ;;  %vm671_vm12 = vmand %vm549_vm0, %vm322_vm6 }
  0xa1   : > { %v335_v17 = vpack.c.bf16 %v331_v16, %v331_v16  ;;  %v488_v18 = vsel %vm487_vm13, %v864_v4, %v865_v3  ;;  %v489_v19 = vsel %vm487_vm13, %v865_v3, %v864_v4  ;;  %vm546_vm7 = vcmp.lt.s32.totalorder %v938_v28, 113  ;;  %vm672_vm13 = vmand %vm550_vm1, %vm323_vm8 }
  0xa2   : > { %v279_v20 = vsel %vm242_vm3, %v214_v13, 0  ;;  %v282_v21 = vsel %vm242_vm3, %v215_v14, 0  ;;  %v340_v22 = vsel %vm242_vm3, %v334_v15, 0  ;;  %v494_v23 = vsel %vm322_vm6, %v488_v18, 0.0  ;;  %v811_v13 = vld [vmem:[%s1138_s1 + $0x18] sm:$0xf] }
  0xa3   : > { %291 = vmatpush.bf16.msra.mxu2 %v279_v20  ;;  %304 = vmatpush.bf16.msra.mxu3 %v282_v21  ;;  %v343_v24 = vsel %vm242_vm3, %v335_v17, 0  ;;  %v858_v25 = vpop.permute.xlu1 %857  ;;  %v495_v27 = vsel %vm323_vm8, %v489_v19, 0.0  ;;  %v498_v33 = vpack.c.bf16 %v494_v23, %v494_v23  ;;  %v899_v63 = vmov 0  }
  0xa4   : > { %352 = vmatpush.bf16.msrb.mxu0 %v340_v22  ;;  %365 = vmatpush.bf16.msrb.mxu1 %v343_v24  ;;  %v860_v29 = vunpack.i.h.bf16 %v858_v25  ;;  %v859_v30 = vunpack.i.l.bf16 %v858_v25  ;;  %v868_v31 = vpop.permute.xlu2 %867  ;;  %v499_v34 = vpack.c.bf16 %v495_v27, %v495_v27 }
  0xa5   : > { %v870_v35 = vunpack.i.h.bf16 %v868_v31  ;;  %v869_v38 = vunpack.i.l.bf16 %v868_v31  ;;  %v504_v51 = vsel %vm242_vm3, %v498_v33, 0  ;;  %881 = vset.pattern.permute.xlu2 %v899_v63  ;;  %882 = vset.pattern.permute.xlu0 %v899_v63 }
  0xa6   : > { %797 = vmatmul.msk.bf16.vlgmr.msra.gmra.mxu2 %vm238_vm9, %v213_v26  ;;  %798 = vmatmul.msk.bf16.vlgmr.msra.gmra.mxu3 %vm238_vm9, %v213_v26  ;;  %v384_v39 = vsel %vm382_vm2, %v860_v29, %v859_v30  ;;  %v383_v40 = vsel %vm382_vm2, %v859_v30, %v860_v29  ;;  %v507_v52 = vsel %vm242_vm3, %v499_v34, 0 }
  0xa7   : > { %v389_v42 = vsel %vm203_vm4, %v384_v39, 0.0  ;;  %v390_v43 = vsel %vm204_vm5, %v383_v40, 0.0  ;;  %v547_v45 = vsel %vm546_vm7, %v869_v38, %v870_v35  ;;  %v548_v46 = vsel %vm546_vm7, %v870_v35, %v869_v38  ;;  %723 = vperm.xlu2 %881, %v720_v62  }
  0xa8   : > { %470 = vmatpush.bf16.msra.mxu1 %v448_v2  ;;  %457 = vmatpush.bf16.msra.mxu0 %v445_v5  ;;  %v393_v47 = vpack.c.bf16 %v389_v42, %v389_v42  ;;  %v394_v48 = vpack.c.bf16 %v390_v43, %v390_v43  ;;  %v557_v49 = vsel %vm1044_vm10, %v547_v45, 0.0  ;;  %v558_v50 = vsel %vm552_vm11, %v548_v46, 0.0 }
  0xa9   : > { %v561_v53 = vpack.c.bf16 %v557_v49, %v557_v49  ;;  %v562_v54 = vpack.c.bf16 %v558_v50, %v558_v50  ;;  %vm609_vm4 = vcmp.lt.s32.totalorder %v938_v28, 112  ;;  %vm668_vm5 = vcmp.lt.s32.totalorder %v938_v28, 111 }
  0xaa   : > { %v399_v55 = vsel %vm242_vm3, %v393_v47, 0  ;;  %v402_v56 = vsel %vm242_vm3, %v394_v48, 0 }
  0xab   : > { %411 = vmatpush.bf16.msrb.mxu2 %v399_v55  ;;  %424 = vmatpush.bf16.msrb.mxu3 %v402_v56  ;;  %v567_v58 = vsel %vm242_vm3, %v561_v53, 0  ;;  %v570_v59 = vsel %vm242_vm3, %v562_v54, 0 }
  0xae   : > { %800 = vmatmul.msk.bf16.vlgmr.msrb.gmra.mxu0 %vm238_vm9, %v799_v57  ;;  %801 = vmatmul.msk.bf16.vlgmr.msrb.gmra.mxu1 %vm238_vm9, %v799_v57 }
  0xaf   : > { %516 = vmatpush.bf16.msra.mxu2 %v504_v51  ;;  %529 = vmatpush.bf16.msra.mxu3 %v507_v52 }
  0xb0   : > { %579 = vmatpush.bf16.msrb.mxu0 %v567_v58  ;;  %592 = vmatpush.bf16.msrb.mxu1 %v570_v59 }
  0xb6   : > { %803 = vmatmul.msk.bf16.vlgmr.msrb.gmra.mxu2 %vm238_vm9, %v802_v60  ;;  %804 = vmatmul.msk.bf16.vlgmr.msrb.gmra.mxu3 %vm238_vm9, %v802_v60 }
  0xbe   : > { %806 = vmatmul.msk.bf16.vlgmr.msra.gmra.mxu0 %vm238_vm9, %v805_v61  ;;  %807 = vmatmul.msk.bf16.vlgmr.msra.gmra.mxu1 %vm238_vm9, %v805_v61 }
  0xc3   : > { %v873_v0 = vpop.permute.xlu0 %872 }
  0xc4   : > { %v875_v2 = vunpack.i.h.bf16 %v873_v0  ;;  %v874_v3 = vunpack.i.l.bf16 %v873_v0 }
  0xc6   : > { %v610_v4 = vsel %vm609_vm4, %v874_v3, %v875_v2  ;;  %v611_v5 = vsel %vm609_vm4, %v875_v2, %v874_v3  ;;  %809 = vmatmul.msk.bf16.vlgmr.msra.gmra.mxu2 %vm238_vm9, %v808_v1  ;;  %810 = vmatmul.msk.bf16.vlgmr.msra.gmra.mxu3 %vm238_vm9, %v808_v1 }
  0xc7   : > { %v616_v6 = vsel %vm549_vm0, %v610_v4, 0.0  ;;  %v617_v7 = vsel %vm550_vm1, %v611_v5, 0.0 }
  0xc8   : > { %v620_v8 = vpack.c.bf16 %v616_v6, %v616_v6  ;;  %v621_v9 = vpack.c.bf16 %v617_v7, %v617_v7 }
  0xca   : > { %v626_v10 = vsel %vm242_vm3, %v620_v8, 0  ;;  %v629_v11 = vsel %vm242_vm3, %v621_v9, 0 }
  0xcb   : > { %v878_v12 = vpop.permute.xlu1 %877  ;;  %638 = vmatpush.bf16.msrb.mxu2 %v626_v10  ;;  %651 = vmatpush.bf16.msrb.mxu3 %v629_v11 }
  0xcc   : > { %v880_v14 = vunpack.i.h.bf16 %v878_v12  ;;  %v879_v15 = vunpack.i.l.bf16 %v878_v12 }
  0xce   : > { %v669_v28 = vsel %vm668_vm5, %v879_v15, %v880_v14  ;;  %v670_v16 = vsel %vm668_vm5, %v880_v14, %v879_v15  ;;  %812 = vmatmul.msk.bf16.vlgmr.msrb.gmra.mxu0 %vm238_vm9, %v811_v13  ;;  %813 = vmatmul.msk.bf16.vlgmr.msrb.gmra.mxu1 %vm238_vm9, %v811_v13 }
  0xcf   : > { %v677_v17 = vsel %vm671_vm12, %v669_v28, 0.0  ;;  %v678_v18 = vsel %vm672_vm13, %v670_v16, 0.0 }
  0xd0   : > { %v681_v19 = vpack.c.bf16 %v677_v17, %v677_v17  ;;  %v682_v41 = vpack.c.bf16 %v678_v18, %v678_v18 }
  0xd2   : > { %v687_v36 = vsel %vm242_vm3, %v681_v19, 0  ;;  %v690_v20 = vsel %vm242_vm3, %v682_v41, 0 }
  0xd3   : > { %699 = vmatpush.bf16.msra.mxu0 %v687_v36  ;;  %712 = vmatpush.bf16.msra.mxu1 %v690_v20 }
  0xd6   : > { %815 = vmatmul.msk.bf16.vlgmr.msrb.gmra.mxu2 %vm238_vm9, %v814_v37  ;;  %816 = vmatmul.msk.bf16.vlgmr.msrb.gmra.mxu3 %vm238_vm9, %v814_v37 }
  0xde   : > { %818 = vmatmul.msk.bf16.vlgmr.msra.gmra.mxu0 %vm238_vm9, %v817_v44  ;;  %819 = vmatmul.msk.bf16.vlgmr.msra.gmra.mxu1 %vm238_vm9, %v817_v44 }
 0x101   : > { %v724_v6 = vpop.permute.xlu2 %723 }
 0x11b   : > { %v258_v21 = vpop.f32.mrf.mxu0  ;;  %v271_v22 = vpop.f32.mrf.mxu1 }
 0x123   : > { %v260_v23 = vpop.f32.mrf.mxu0  ;;  %v273_v24 = vpop.f32.mrf.mxu1 }
 0x129   : > { %v293_v25 = vpop.f32.mrf.mxu2  ;;  %v306_v26 = vpop.f32.mrf.mxu3 }
 0x12a   : > { %v294_v46 = vadd.f32 %v293_v25, %v258_v21  ;;  %v307_v47 = vadd.f32 %v306_v26, %v271_v22 }
 0x12b   : > { %v354_v27 = vpop.f32.mrf.mxu0  ;;  %v367_v29 = vpop.f32.mrf.mxu1 }
 0x12c   : > { %v371_v52 = vadd.f32 %v354_v27, %v294_v46  ;;  %v372_v53 = vadd.f32 %v367_v29, %v307_v47 }
 0x131   : > { %v295_v30 = vpop.f32.mrf.mxu2  ;;  %v308_v31 = vpop.f32.mrf.mxu3 }
 0x133   : > { %v356_v32 = vpop.f32.mrf.mxu0  ;;  %v369_v33 = vpop.f32.mrf.mxu1 }
 0x139   : > { %v413_v34 = vpop.f32.mrf.mxu2  ;;  %v426_v35 = vpop.f32.mrf.mxu3 }
 0x13a   : > { %v430_v54 = vadd.f32 %v413_v34, %v371_v52  ;;  %v431_v55 = vadd.f32 %v426_v35, %v372_v53 }
 0x13b   : > { %v459_v38 = vpop.f32.mrf.mxu0  ;;  %v472_v39 = vpop.f32.mrf.mxu1 }
 0x13c   : > { %v476_v58 = vadd.f32 %v459_v38, %v430_v54  ;;  %v477_v59 = vadd.f32 %v472_v39, %v431_v55 }
 0x141   : > { %v415_v40 = vpop.f32.mrf.mxu2  ;;  %v428_v42 = vpop.f32.mrf.mxu3 }
 0x143   : > { %v461_v43 = vpop.f32.mrf.mxu0  ;;  %v474_v45 = vpop.f32.mrf.mxu1 }
 0x149   : > { %v518_v48 = vpop.f32.mrf.mxu2  ;;  %v531_v49 = vpop.f32.mrf.mxu3 }
 0x14a   : > { %v535_v62 = vadd.f32 %v518_v48, %v476_v58  ;;  %v536_v63 = vadd.f32 %v531_v49, %v477_v59 }
 0x14b   : > { %v581_v50 = vpop.f32.mrf.mxu0  ;;  %v594_v51 = vpop.f32.mrf.mxu1 }
 0x14c   : > { %v598_v0 = vadd.f32 %v581_v50, %v535_v62  ;;  %v599_v1 = vadd.f32 %v594_v51, %v536_v63 }
 0x151   : > { %v520_v56 = vpop.f32.mrf.mxu2  ;;  %v533_v57 = vpop.f32.mrf.mxu3 }
 0x153   : > { %v583_v60 = vpop.f32.mrf.mxu0  ;;  %v596_v61 = vpop.f32.mrf.mxu1 }
 0x159   : > { %v640_v2 = vpop.f32.mrf.mxu2  ;;  %v653_v3 = vpop.f32.mrf.mxu3 }
 0x15a   : > { %v657_v4 = vadd.f32 %v640_v2, %v598_v0  ;;  %v658_v5 = vadd.f32 %v653_v3, %v599_v1 }
 0x15b   : > { %v701_v7 = vpop.f32.mrf.mxu0  ;;  %v714_v8 = vpop.f32.mrf.mxu1 }
 0x15c   : > { %v718_v9 = vadd.f32 %v701_v7, %v657_v4  ;;  %v719_v10 = vadd.f32 %v714_v8, %v658_v5 }
 0x15e   : > { %v726_v11 = vadd.f32 %v724_v6, %v718_v9  ;;  %v727_v12 = vadd.f32 %v724_v6, %v719_v10 }
 0x160   : > { %728 = vst [vmem:[%s170_s24] sm:$0xff] %v726_v11 }
 0x161   : > { %729 = vst [vmem:[%s170_s24 + $0x8] sm:$0xff] %v727_v12  ;;  %v642_v13 = vpop.f32.mrf.mxu2  ;;  %v655_v14 = vpop.f32.mrf.mxu3 }
 0x163   : > { %v703_v15 = vpop.f32.mrf.mxu0  ;;  %v716_v28 = vpop.f32.mrf.mxu1 }
 0x164 PF: > { %s13_s12 = sadd.s32 1, %s889_s12  }
 0x165   : > { %p10_p4 = scmp.ge.s32.totalorder %s13_s12, 4  }
 0x167   :  { %12 = sbr.rel (!%p10_p4) target bundleno = 1 (0x1), region = 70 }

</bundles_post_ra>
